<compile_context>
chip_gen: v6e
topology: v6e:2x2x1
jax: 0.10.0
libtpu: 0.0.40
codegen_flags: <defaults>
</compile_context>

<pallas_src>
import math
import numpy as np
import jax
import jax.numpy as jnp
from jax import lax
from jax.experimental import pallas as pl
from jax.experimental.pallas import tpu as pltpu

# --------------------------- small, module-consistent config ---------------------------
B = 2              # batch_size
L = 16             # seq_len
C = 4              # enc_in
SEG = 4            # seg_len
PRED = 8           # pred_len
DM = 32            # d_model
SX = L // SEG      # seg_num_x
SY = PRED // SEG   # seg_num_y
DSTATE = 8         # mamba d_state
DI = 2 * C         # mamba d_inner (expand=2)
DCONV = 4          # mamba d_conv
DTRANK = max(1, int(math.ceil(C / 16)))   # mamba dt_rank
EPS = 1e-5
F32 = jnp.float32
FLAT = DI * DSTATE  # flattened (channel, state) width used by the scan
SLAB_W = 128        # lane-dense parameter slab


def _softplus(x):
    # matches torch.nn.functional.softplus (threshold=20)
    return jnp.where(x > 20.0, x, jnp.log(1.0 + jnp.exp(jnp.minimum(x, 20.0))))


def _mm(a, b):
    # pin MXU precision so an ambient default_matmul_precision scope can't change it
    return jnp.dot(a, b, preferred_element_type=F32, precision=lax.Precision.DEFAULT)


# ===================================== fused kernel ====================================
def make_kernel(off, nb):
    """Fused kernel processing `nb` batch elements per grid step."""
    NR = nb * L        # stacked rows for the mamba part
    W = nb * C         # lane width of the ISMRNN core

    def kernel(x_ref, slab_ref, w1_ref, o_ref):
        def P(name):
            r, nrows, ncols = off[name]
            return slab_ref[r:r + nrows, 0:ncols]

        # -------- per-batch centering; assemble (NR, C) blocked row stack --------------
        xcs, seqs = [], []
        for i in range(nb):
            xi = x_ref[i]                      # (L, C)
            si = xi[L - 1:L, :]                # (1, C) last time step
            seqs.append(si)
            xcs.append(xi - si)                # revin=False branch
        xc = xcs[0] if nb == 1 else jnp.concatenate(xcs, axis=0)    # (NR, C)

        # row-in-batch index for causal / batch-boundary masks (L is a power of two)
        rib = jnp.bitwise_and(lax.broadcasted_iota(jnp.int32, (NR, FLAT), 0), L - 1)

        def shift_down(arr, rows, fill):
            """arr shifted down by `rows` time steps within each batch block."""
            nr, nc = arr.shape
            top = jnp.full((rows, nc), fill, F32)
            sh = jnp.concatenate([top, arr[:nr - rows, :]], axis=0)
            return jnp.where(rib[:, :nc] >= rows, sh, fill)

        # ------------------------- Mamba residual block (rows = nb*L) ------------------
        inv = lax.rsqrt(jnp.mean(xc * xc, axis=1, keepdims=True) + EPS)
        xn = xc * inv * P('g_row')                       # RMSNorm, (NR, C)
        xz = _mm(xn, P('win_t'))                         # (NR, 2*DI)
        xh = xz[:, :DI]
        res = xz[:, DI:]

        # depthwise causal conv1d: masked shifts + FMAs (no MXU round trips)
        convw = P('convw')                               # (DCONV, DI), row s = w[:, DCONV-1-s]
        conv = xh * convw[0:1, :]
        for s in range(1, DCONV):
            conv = conv + shift_down(xh, s, 0.0) * convw[s:s + 1, :]
        conv = conv + P('convb_row')
        u = conv * jax.nn.sigmoid(conv)                  # silu

        # x_proj (B, C) and delta (dt_rank fold done host-side)
        xBC = _mm(u, P('wBC_t'))                         # (NR, 2*DSTATE)
        Bm = xBC[:, :DSTATE]
        Cm = xBC[:, DSTATE:]
        delta = _softplus(_mm(u, P('wdel_full')) + P('bdt_row'))    # (NR, DI)

        # scan precompute: ONE exp over the whole (NR, FLAT) block
        dA = jnp.exp(_mm(delta, P('r8')) * P('aflat'))               # (NR, FLAT)
        dBu = _mm(delta * u, P('r8')) * _mm(Bm, P('t8'))             # (NR, FLAT)
        c_rep = _mm(Cm, P('t8'))                                     # (NR, FLAT)

        # log-depth associative scan: s_t = dA_t * s_{t-1} + dBu_t for each batch block
        a_s, b_s = dA, dBu
        d = 1
        while d < L:
            sh_b = shift_down(b_s, d, 0.0)
            b_new = a_s * sh_b + b_s
            if d * 2 < L:                                 # a not needed after last level
                a_s = a_s * shift_down(a_s, d, 1.0)
            b_s = b_new
            d *= 2

        y = _mm(b_s * c_rep, P('gmat'))                   # (NR, DI)
        y = y + u * P('d_row')
        y = y * (res * jax.nn.sigmoid(res))               # gate with silu(res)
        xm = _mm(y, P('wout_t')) + xc                     # (NR, C)

        # --------------------- ISMRNN core (DM on sublanes, nb*C on lanes) -------------
        if nb == 1:
            xm_wide = xm                                  # (L, C)
        else:
            xm_wide = jnp.concatenate(
                [xm[i * L:(i + 1) * L, :] for i in range(nb)], axis=1)   # (L, W)

        cols = P('cols')                                  # (DM, 2+SY+SX) packed columns
        b2eff_col = cols[:, 0:1]
        bhh_col = cols[:, 1:2]
        posproj = cols[:, 2:2 + SY]                       # W_ih @ pos_emb^T + b_ih (host fold)
        ebias = cols[:, 2 + SY:2 + SY + SX]               # W_ih@(b1[k]*w3sum+b3)+b_ih+b_hh

        w_hh = P('w_hh')
        baseT = _mm(P('w3'), xm_wide)                     # (DM, W)
        shT = _mm(P('w2eff_t'), xm_wide) + b2eff_col      # linear2 (with linear1 folded)
        G = _mm(P('w_ih'), baseT)                         # hoisted out of the RNN loop

        # tanh-RNN encoder: per step only matmul + scalar-mul + add + tanh on the chain
        h = jnp.tanh(w1_ref[0] * G + ebias[:, 0:1])       # k = 0 (h_prev = 0)
        for k in range(1, SX):
            h = jnp.tanh(w1_ref[k] * G + ebias[:, k:k + 1] + _mm(w_hh, h))
        hn = h + shT                                      # (DM, W)

        # pmf decode: one RNN step per pos_emb row, then predict head
        hW = _mm(w_hh, hn) + bhh_col                      # (DM, W)
        pred = P('pred')                                  # (SEG, DM+1) = [W_pred | b_pred]
        w_pred = pred[:, 0:DM]
        bpred_col = pred[:, DM:DM + 1]
        yps = []
        for sy in range(SY):
            hd = jnp.tanh(hW + posproj[:, sy:sy + 1])     # (DM, W)
            yps.append(_mm(w_pred, hd) + bpred_col)       # (SEG, W)
        y_wide = jnp.concatenate(yps, axis=0)             # (PRED, W)

        # output already (pred_len, enc_in) per batch; fold the "+ seq_last" here
        for i in range(nb):
            o_ref[i] = y_wide[:, i * C:(i + 1) * C] + seqs[i]

    return kernel


# ==================================== wrapper ==========================================
def ismrnn_forward(x, slab, w1_vec, off, nb):
    kernel = make_kernel(off, nb)
    n_steps = B // nb
    return pl.pallas_call(
        kernel,
        out_shape=jax.ShapeDtypeStruct((B, PRED, C), F32),
        grid=(n_steps,),
        in_specs=[
            pl.BlockSpec((nb, L, C), lambda g: (g, 0, 0)),
            pl.BlockSpec(slab.shape, lambda g: (0, 0)),
            pl.BlockSpec(memory_space=pltpu.MemorySpace.SMEM),   # w1 scalars
        ],
        out_specs=pl.BlockSpec((nb, PRED, C), lambda g: (g, 0, 0)),
        compiler_params=pltpu.CompilerParams(
            dimension_semantics=("parallel",)),
    )(x, slab, w1_vec)


# ============================ deterministic parameter init ============================
def init_params(key):
    ks = jax.random.split(key, 20)

    def rn(k, shape, scale=0.1):
        return (scale * jax.random.normal(k, shape)).astype(F32)

    tp = {}
    # Mamba block (d_model = enc_in, expand=2, d_conv=4, d_state=DSTATE, dt_rank=DTRANK)
    tp['rms_g'] = jnp.ones((C,), F32)
    tp['W_in'] = rn(ks[0], (2 * DI, C))
    tp['conv_w'] = rn(ks[1], (DI, DCONV))           # depthwise conv weight[ch, 0, j]
    tp['conv_b'] = rn(ks[2], (DI,))
    tp['W_xproj'] = rn(ks[3], (DTRANK + 2 * DSTATE, DI))
    tp['W_dt'] = rn(ks[4], (DI, DTRANK))
    tp['b_dt'] = rn(ks[5], (DI,))
    tp['A_log'] = jnp.log(jnp.tile(jnp.arange(1, DSTATE + 1, dtype=F32)[None, :], (DI, 1)))
    tp['D'] = jnp.ones((DI,), F32)
    tp['W_out'] = rn(ks[6], (C, DI))
    # ISMRNN
    tp['W1'] = rn(ks[7], (SX, 1));  tp['b1'] = rn(ks[8], (SX,))           # linear1: 1 -> seg_num_x
    tp['W2'] = rn(ks[9], (DM, L * SX)); tp['b2'] = rn(ks[10], (DM,))      # linear2
    tp['W3'] = rn(ks[11], (DM, L)); tp['b3'] = rn(ks[12], (DM,))          # linear3
    tp['W_ih'] = rn(ks[13], (DM, DM)); tp['b_ih'] = rn(ks[14], (DM,))     # nn.RNN (tanh)
    tp['W_hh'] = rn(ks[15], (DM, DM)); tp['b_hh'] = rn(ks[16], (DM,))
    tp['pos_emb'] = rn(ks[17], (SY, DM), scale=1.0)
    tp['W_pred'] = rn(ks[18], (SEG, DM)); tp['b_pred'] = rn(ks[19], (SEG,))
    return tp


# ====================== parameter slab (exact algebraic folds, f64) ====================
def _pack_slab(entries):
    blocks, offsets, r = [], {}, 0
    for name, arr in entries:
        a = np.asarray(arr, dtype=np.float32)
        if a.ndim == 1:
            a = a[None, :]
        nr, nc = a.shape
        assert nc <= SLAB_W, (name, a.shape)
        nr_pad = ((nr + 7) // 8) * 8
        blk = np.zeros((nr_pad, SLAB_W), np.float32)
        blk[:nr, :nc] = a
        offsets[name] = (r, nr, nc)
        blocks.append(blk)
        r += nr_pad
    return jnp.asarray(np.concatenate(blocks, axis=0)), offsets


def kernelize_params(tp):
    f64 = np.float64
    W_in = np.asarray(tp['W_in'], f64)
    conv_w = np.asarray(tp['conv_w'], f64)
    convw_rows = conv_w.T[::-1, :].copy()                      # row s = conv_w[:, DCONV-1-s]

    Wx = np.asarray(tp['W_xproj'], f64)
    wBC_t = np.concatenate([Wx[DTRANK:DTRANK + DSTATE].T,
                            Wx[DTRANK + DSTATE:].T], axis=1)   # (DI, 2*DSTATE)
    wdel_full = Wx[:DTRANK].T @ np.asarray(tp['W_dt'], f64).T  # (DI, DI) dt_rank fold

    A = -np.exp(np.asarray(tp['A_log'], f64))                  # (DI, DSTATE)
    aflat = A.reshape(1, FLAT)
    r8 = np.zeros((DI, FLAT), f64)                             # delta/u expansion
    t8 = np.zeros((DSTATE, FLAT), f64)                         # B/C expansion
    gmat = np.zeros((FLAT, DI), f64)                           # per-channel state sum
    for d in range(DI):
        for n in range(DSTATE):
            r8[d, d * DSTATE + n] = 1.0
            t8[n, d * DSTATE + n] = 1.0
            gmat[d * DSTATE + n, d] = 1.0

    # exact fold of linear1 into linear2/linear3 and of the RNN biases (pure param algebra)
    w1v = np.asarray(tp['W1'], f64)[:, 0]
    b1v = np.asarray(tp['b1'], f64)
    W2r = np.asarray(tp['W2'], f64).reshape(DM, L, SX)
    w2eff = np.einsum('dlk,k->ld', W2r, w1v)                   # (L, DM)
    b2eff = np.asarray(tp['b2'], f64) + np.einsum('dlk,k->d', W2r, b1v)
    W3 = np.asarray(tp['W3'], f64)
    w3sum = W3.sum(axis=1)
    W_ih = np.asarray(tp['W_ih'], f64)
    b_ih = np.asarray(tp['b_ih'], f64)
    b_hh = np.asarray(tp['b_hh'], f64)
    ebias = (W_ih @ (np.outer(w3sum, b1v) + np.asarray(tp['b3'], f64)[:, None])
             + (b_ih + b_hh)[:, None])                         # (DM, SX)
    posproj = W_ih @ np.asarray(tp['pos_emb'], f64).T + b_ih[:, None]   # (DM, SY)
    cols = np.concatenate([b2eff[:, None], b_hh[:, None], posproj, ebias], axis=1)
    pred = np.concatenate([np.asarray(tp['W_pred'], f64),
                           np.asarray(tp['b_pred'], f64)[:, None]], axis=1)   # (SEG, DM+1)

    entries = [
        ('g_row', np.asarray(tp['rms_g'], f64)[None, :]),      # (1, C)
        ('win_t', W_in.T),                                     # (C, 2*DI)
        ('convw', convw_rows),                                 # (DCONV, DI)
        ('convb_row', np.asarray(tp['conv_b'], f64)[None, :]), # (1, DI)
        ('wBC_t', wBC_t), ('wdel_full', wdel_full),
        ('bdt_row', np.asarray(tp['b_dt'], f64)[None, :]),     # (1, DI)
        ('r8', r8), ('t8', t8), ('aflat', aflat),
        ('d_row', np.asarray(tp['D'], f64)[None, :]),          # (1, DI)
        ('gmat', gmat),
        ('wout_t', np.asarray(tp['W_out'], f64).T),            # (DI, C)
        ('w3', W3),                                            # (DM, L)
        ('w2eff_t', w2eff.T),                                  # (DM, L)
        ('cols', cols),                                        # (DM, 2+SY+SX)
        ('w_ih', W_ih), ('w_hh', np.asarray(tp['W_hh'], f64)),
        ('pred', pred),                                        # (SEG, DM+1)
    ]
    slab, off = _pack_slab(entries)
    w1_vec = jnp.asarray(w1v.astype(np.float32))               # -> SMEM scalars
    return slab, off, w1_vec


# ============================== plain-JAX reference ===================================
def reference_forward(x, tp):
    seq_last = x[:, -1:, :]
    xc = x - seq_last

    def block(xb):                                    # (L, C) mamba-minimal residual block
        inv = jax.lax.rsqrt(jnp.mean(xb * xb, -1, keepdims=True) + EPS)
        xn = xb * inv * tp['rms_g']
        xz = xn @ tp['W_in'].T
        xh, res = xz[:, :DI], xz[:, DI:]
        pad = jnp.concatenate([jnp.zeros((DCONV - 1, DI), F32), xh], axis=0)
        conv = jnp.zeros((L, DI), F32)
        for j in range(DCONV):
            conv = conv + pad[j:j + L, :] * tp['conv_w'][:, j][None, :]
        conv = conv + tp['conv_b'][None, :]
        u = jax.nn.silu(conv)
        xdbl = u @ tp['W_xproj'].T
        dlt = xdbl[:, :DTRANK]
        Bm = xdbl[:, DTRANK:DTRANK + DSTATE]
        Cm = xdbl[:, DTRANK + DSTATE:]
        delta = _softplus(dlt @ tp['W_dt'].T + tp['b_dt'][None, :])
        A = -jnp.exp(tp['A_log'])
        s = jnp.zeros((DI, DSTATE), F32)
        ys = []
        for t in range(L):
            s = jnp.exp(delta[t][:, None] * A) * s + delta[t][:, None] * Bm[t][None, :] * u[t][:, None]
            ys.append(s @ Cm[t])
        y = jnp.stack(ys, axis=0) + u * tp['D'][None, :]
        y = y * jax.nn.silu(res)
        return y @ tp['W_out'].T + xb

    xm = jax.vmap(block)(xc)                                      # (B, L, C)
    xp = jnp.transpose(xm, (0, 2, 1))[..., None]                  # (B, C, L, 1)
    seg = xp * tp['W1'][:, 0] + tp['b1']                          # (B, C, L, SX)
    sh = seg.reshape(B, C, L * SX) @ tp['W2'].T + tp['b2']        # linear2
    sh = sh.reshape(B * C, DM)
    st = jnp.transpose(seg, (0, 1, 3, 2)) @ tp['W3'].T + tp['b3'] # linear3
    st = st.reshape(B * C, SX, DM)
    h = jnp.zeros((B * C, DM), F32)
    for k in range(SX):
        h = jnp.tanh(st[:, k, :] @ tp['W_ih'].T + tp['b_ih'] + h @ tp['W_hh'].T + tp['b_hh'])
    hn = h + sh
    pW = tp['pos_emb'] @ tp['W_ih'].T + tp['b_ih']
    hW = hn @ tp['W_hh'].T + tp['b_hh']
    hd = jnp.tanh(hW[:, None, :] + pW[None, :, :])                # (B*C, SY, DM)
    yp = hd @ tp['W_pred'].T + tp['b_pred']                       # (B*C, SY, SEG)
    y = yp.reshape(B, C, PRED)
    return jnp.transpose(y, (0, 2, 1)) + seq_last


# ======================================= main =========================================
if __name__ == "__main__":
    key = jax.random.PRNGKey(0)
    kx, kparam = jax.random.split(key)
    x = jax.random.normal(kx, (B, L, C), dtype=F32)

    tp = init_params(kparam)
    slab, off, w1_vec = kernelize_params(tp)

    # generation-conditional grid: v7x (2 TCs) -> one batch element per core;
    # single-TC chips (v5e/v6e/...) -> whole batch merged into one grid step.
    kind = jax.devices()[0].device_kind.lower()
    nb = 1 if ("v7" in kind or "7x" in kind) else B

    fwd = jax.jit(lambda xx, ss, ww: ismrnn_forward(xx, ss, ww, off, nb))
    y = jax.block_until_ready(fwd(x, slab, w1_vec))
    assert y.shape == (B, PRED, C)

    with jax.default_matmul_precision("highest"):
        y_ref = reference_forward(x, tp)
    y_ref = jax.block_until_ready(y_ref)

    diff = float(np.max(np.abs(np.asarray(y) - np.asarray(y_ref))))
    if not np.allclose(np.asarray(y), np.asarray(y_ref), rtol=3e-2, atol=3e-2):
        raise AssertionError(f"kernel/reference mismatch, max abs diff = {diff}")

    print("KERNEL_OK")
</pallas_src>

<mosaic_0001>
module attributes {stable_mosaic.version = 11 : i64} {
  func.func @kernel(%arg0: i32, %arg1: memref<2x16x4xf32, #tpu.memory_space<vmem>>, %arg2: memref<328x128xf32, #tpu.memory_space<vmem>>, %arg3: memref<4xf32, #tpu.memory_space<smem>>, %arg4: memref<2x8x4xf32, #tpu.memory_space<vmem>>) attributes {dimension_semantics = [#tpu.dimension_semantics<parallel>], iteration_bounds = array<i64: 1>, scalar_prefetch = 0 : i64, scratch_operands = 0 : i64, tpu.core_type = #tpu.core_type<tc>, window_params = [{transform_indices = @transform_0, window_bounds = array<i64: 2, 16, 4>}, {pipeline_mode = #tpu.pipeline_mode<synchronous>, transform_indices = @transform_1, window_bounds = array<i64: 328, 128>}, {transform_indices = @transform_2, window_bounds = array<i64: 4>}, {transform_indices = @transform_3, window_bounds = array<i64: 2, 8, 4>}]} {
    %c0 = arith.constant 0 : index
    %c0_0 = arith.constant 0 : index
    %c0_1 = arith.constant 0 : index
    %0 = vector.load %arg1[%c0, %c0_0, %c0_1] : memref<2x16x4xf32, #tpu.memory_space<vmem>>, vector<1x16x4xf32>
    %1 = vector.shape_cast %0 : vector<1x16x4xf32> to vector<16x4xf32>
    %2 = vector.extract_strided_slice %1 {offsets = [15, 0], sizes = [1, 4], strides = [1, 1]} : vector<16x4xf32> to vector<1x4xf32>
    %3 = vector.broadcast %2 : vector<1x4xf32> to vector<16x4xf32>
    %4 = arith.subf %1, %3 : vector<16x4xf32>
    %c1 = arith.constant 1 : index
    %c0_2 = arith.constant 0 : index
    %c0_3 = arith.constant 0 : index
    %5 = vector.load %arg1[%c1, %c0_2, %c0_3] : memref<2x16x4xf32, #tpu.memory_space<vmem>>, vector<1x16x4xf32>
    %6 = vector.shape_cast %5 : vector<1x16x4xf32> to vector<16x4xf32>
    %7 = vector.extract_strided_slice %6 {offsets = [15, 0], sizes = [1, 4], strides = [1, 1]} : vector<16x4xf32> to vector<1x4xf32>
    %8 = vector.broadcast %7 : vector<1x4xf32> to vector<16x4xf32>
    %9 = arith.subf %6, %8 : vector<16x4xf32>
    %10 = tpu.concatenate %4, %9 in 0 : vector<16x4xf32>, vector<16x4xf32> -> vector<32x4xf32>
    %11 = tpu.iota {dimensions = array<i32: 0>} : vector<32x64xi32>
    %c15_i32 = arith.constant 15 : i32
    %12 = vector.broadcast %c15_i32 : i32 to vector<32x64xi32>
    %13 = arith.andi %11, %12 : vector<32x64xi32>
    %14 = arith.mulf %10, %10 : vector<32x4xf32>
    %cst = arith.constant dense<0.000000e+00> : vector<32xf32>
    %15 = vector.multi_reduction <add>, %14, %cst [1] : vector<32x4xf32> to vector<32xf32>
    %16 = vector.shape_cast %15 : vector<32xf32> to vector<32x1xf32>
    %cst_4 = arith.constant 4.000000e+00 : f32
    %17 = vector.broadcast %cst_4 : f32 to vector<32x1xf32>
    %18 = arith.divf %16, %17 : vector<32x1xf32>
    %cst_5 = arith.constant 9.99999974E-6 : f32
    %19 = vector.broadcast %cst_5 : f32 to vector<32x1xf32>
    %20 = arith.addf %18, %19 : vector<32x1xf32>
    %21 = math.rsqrt %20 : vector<32x1xf32>
    %22 = vector.broadcast %21 : vector<32x1xf32> to vector<32x4xf32>
    %23 = arith.mulf %10, %22 : vector<32x4xf32>
    %c0_6 = arith.constant 0 : index
    %c0_7 = arith.constant 0 : index
    %24 = vector.load %arg2[%c0_6, %c0_7] : memref<328x128xf32, #tpu.memory_space<vmem>>, vector<1x4xf32>
    %25 = vector.broadcast %24 : vector<1x4xf32> to vector<32x4xf32>
    %26 = arith.mulf %23, %25 : vector<32x4xf32>
    %c8 = arith.constant 8 : index
    %c0_8 = arith.constant 0 : index
    %27 = vector.load %arg2[%c8, %c0_8] : memref<328x128xf32, #tpu.memory_space<vmem>>, vector<4x16xf32>
    %cst_9 = arith.constant dense<0.000000e+00> : vector<32x16xf32>
    %28 = tpu.matmul %26, %27, %cst_9 {dimension_numbers = #tpu.dot_dimension_numbers<[1], [0], [0], [1], [0, 0, 1, 1], [], []>} : vector<32x4xf32>, vector<4x16xf32>, vector<32x16xf32> -> vector<32x16xf32>
    %29 = vector.extract_strided_slice %28 {offsets = [0, 0], sizes = [32, 8], strides = [1, 1]} : vector<32x16xf32> to vector<32x8xf32>
    %30 = vector.extract_strided_slice %28 {offsets = [0, 8], sizes = [32, 8], strides = [1, 1]} : vector<32x16xf32> to vector<32x8xf32>
    %c16 = arith.constant 16 : index
    %c0_10 = arith.constant 0 : index
    %31 = vector.load %arg2[%c16, %c0_10] : memref<328x128xf32, #tpu.memory_space<vmem>>, vector<4x8xf32>
    %32 = vector.extract_strided_slice %31 {offsets = [0, 0], sizes = [1, 8], strides = [1, 1]} : vector<4x8xf32> to vector<1x8xf32>
    %33 = vector.broadcast %32 : vector<1x8xf32> to vector<32x8xf32>
    %34 = arith.mulf %29, %33 : vector<32x8xf32>
    %cst_11 = arith.constant 0.000000e+00 : f32
    %35 = vector.broadcast %cst_11 : f32 to vector<1x8xf32>
    %36 = vector.extract_strided_slice %29 {offsets = [0, 0], sizes = [31, 8], strides = [1, 1]} : vector<32x8xf32> to vector<31x8xf32>
    %37 = tpu.concatenate %35, %36 in 0 : vector<1x8xf32>, vector<31x8xf32> -> vector<32x8xf32>
    %38 = vector.extract_strided_slice %13 {offsets = [0, 0], sizes = [32, 8], strides = [1, 1]} : vector<32x64xi32> to vector<32x8xi32>
    %c1_i32 = arith.constant 1 : i32
    %39 = vector.broadcast %c1_i32 : i32 to vector<32x8xi32>
    %40 = arith.cmpi sge, %38, %39 : vector<32x8xi32>
    %cst_12 = arith.constant 0.000000e+00 : f32
    %41 = vector.broadcast %cst_12 : f32 to vector<32x8xf32>
    %42 = arith.select %40, %37, %41 : vector<32x8xi1>, vector<32x8xf32>
    %43 = vector.extract_strided_slice %31 {offsets = [1, 0], sizes = [1, 8], strides = [1, 1]} : vector<4x8xf32> to vector<1x8xf32>
    %44 = vector.broadcast %43 : vector<1x8xf32> to vector<32x8xf32>
    %45 = arith.mulf %42, %44 : vector<32x8xf32>
    %46 = arith.addf %34, %45 : vector<32x8xf32>
    %cst_13 = arith.constant 0.000000e+00 : f32
    %47 = vector.broadcast %cst_13 : f32 to vector<2x8xf32>
    %48 = vector.extract_strided_slice %29 {offsets = [0, 0], sizes = [30, 8], strides = [1, 1]} : vector<32x8xf32> to vector<30x8xf32>
    %49 = tpu.concatenate %47, %48 in 0 : vector<2x8xf32>, vector<30x8xf32> -> vector<32x8xf32>
    %50 = vector.extract_strided_slice %13 {offsets = [0, 0], sizes = [32, 8], strides = [1, 1]} : vector<32x64xi32> to vector<32x8xi32>
    %c2_i32 = arith.constant 2 : i32
    %51 = vector.broadcast %c2_i32 : i32 to vector<32x8xi32>
    %52 = arith.cmpi sge, %50, %51 : vector<32x8xi32>
    %cst_14 = arith.constant 0.000000e+00 : f32
    %53 = vector.broadcast %cst_14 : f32 to vector<32x8xf32>
    %54 = arith.select %52, %49, %53 : vector<32x8xi1>, vector<32x8xf32>
    %55 = vector.extract_strided_slice %31 {offsets = [2, 0], sizes = [1, 8], strides = [1, 1]} : vector<4x8xf32> to vector<1x8xf32>
    %56 = vector.broadcast %55 : vector<1x8xf32> to vector<32x8xf32>
    %57 = arith.mulf %54, %56 : vector<32x8xf32>
    %58 = arith.addf %46, %57 : vector<32x8xf32>
    %cst_15 = arith.constant 0.000000e+00 : f32
    %59 = vector.broadcast %cst_15 : f32 to vector<3x8xf32>
    %60 = vector.extract_strided_slice %29 {offsets = [0, 0], sizes = [29, 8], strides = [1, 1]} : vector<32x8xf32> to vector<29x8xf32>
    %61 = tpu.concatenate %59, %60 in 0 : vector<3x8xf32>, vector<29x8xf32> -> vector<32x8xf32>
    %62 = vector.extract_strided_slice %13 {offsets = [0, 0], sizes = [32, 8], strides = [1, 1]} : vector<32x64xi32> to vector<32x8xi32>
    %c3_i32 = arith.constant 3 : i32
    %63 = vector.broadcast %c3_i32 : i32 to vector<32x8xi32>
    %64 = arith.cmpi sge, %62, %63 : vector<32x8xi32>
    %cst_16 = arith.constant 0.000000e+00 : f32
    %65 = vector.broadcast %cst_16 : f32 to vector<32x8xf32>
    %66 = arith.select %64, %61, %65 : vector<32x8xi1>, vector<32x8xf32>
    %67 = vector.extract_strided_slice %31 {offsets = [3, 0], sizes = [1, 8], strides = [1, 1]} : vector<4x8xf32> to vector<1x8xf32>
    %68 = vector.broadcast %67 : vector<1x8xf32> to vector<32x8xf32>
    %69 = arith.mulf %66, %68 : vector<32x8xf32>
    %70 = arith.addf %58, %69 : vector<32x8xf32>
    %c24 = arith.constant 24 : index
    %c0_17 = arith.constant 0 : index
    %71 = vector.load %arg2[%c24, %c0_17] : memref<328x128xf32, #tpu.memory_space<vmem>>, vector<1x8xf32>
    %72 = vector.broadcast %71 : vector<1x8xf32> to vector<32x8xf32>
    %73 = arith.addf %70, %72 : vector<32x8xf32>
    %74 = arith.negf %73 : vector<32x8xf32>
    %75 = math.exp %74 : vector<32x8xf32>
    %cst_18 = arith.constant 1.000000e+00 : f32
    %76 = vector.broadcast %cst_18 : f32 to vector<32x8xf32>
    %77 = arith.addf %76, %75 : vector<32x8xf32>
    %78 = arith.divf %76, %77 : vector<32x8xf32>
    %79 = arith.mulf %73, %78 : vector<32x8xf32>
    %c32 = arith.constant 32 : index
    %c0_19 = arith.constant 0 : index
    %80 = vector.load %arg2[%c32, %c0_19] : memref<328x128xf32, #tpu.memory_space<vmem>>, vector<8x16xf32>
    %cst_20 = arith.constant dense<0.000000e+00> : vector<32x16xf32>
    %81 = tpu.matmul %79, %80, %cst_20 {dimension_numbers = #tpu.dot_dimension_numbers<[1], [0], [0], [1], [0, 0, 1, 1], [], []>} : vector<32x8xf32>, vector<8x16xf32>, vector<32x16xf32> -> vector<32x16xf32>
    %82 = vector.extract_strided_slice %81 {offsets = [0, 0], sizes = [32, 8], strides = [1, 1]} : vector<32x16xf32> to vector<32x8xf32>
    %83 = vector.extract_strided_slice %81 {offsets = [0, 8], sizes = [32, 8], strides = [1, 1]} : vector<32x16xf32> to vector<32x8xf32>
    %c40 = arith.constant 40 : index
    %c0_21 = arith.constant 0 : index
    %84 = vector.load %arg2[%c40, %c0_21] : memref<328x128xf32, #tpu.memory_space<vmem>>, vector<8x8xf32>
    %cst_22 = arith.constant dense<0.000000e+00> : vector<32x8xf32>
    %85 = tpu.matmul %79, %84, %cst_22 {dimension_numbers = #tpu.dot_dimension_numbers<[1], [0], [0], [1], [0, 0, 1, 1], [], []>} : vector<32x8xf32>, vector<8x8xf32>, vector<32x8xf32> -> vector<32x8xf32>
    %c48 = arith.constant 48 : index
    %c0_23 = arith.constant 0 : index
    %86 = vector.load %arg2[%c48, %c0_23] : memref<328x128xf32, #tpu.memory_space<vmem>>, vector<1x8xf32>
    %87 = vector.broadcast %86 : vector<1x8xf32> to vector<32x8xf32>
    %88 = arith.addf %85, %87 : vector<32x8xf32>
    %cst_24 = arith.constant 2.000000e+01 : f32
    %89 = vector.broadcast %cst_24 : f32 to vector<32x8xf32>
    %90 = arith.cmpf ogt, %88, %89 : vector<32x8xf32>
    %cst_25 = arith.constant 2.000000e+01 : f32
    %91 = vector.broadcast %cst_25 : f32 to vector<32x8xf32>
    %92 = arith.minimumf %88, %91 : vector<32x8xf32>
    %93 = math.exp %92 : vector<32x8xf32>
    %cst_26 = arith.constant 1.000000e+00 : f32
    %94 = vector.broadcast %cst_26 : f32 to vector<32x8xf32>
    %95 = arith.addf %94, %93 : vector<32x8xf32>
    %96 = math.log %95 : vector<32x8xf32>
    %97 = arith.select %90, %88, %96 : vector<32x8xi1>, vector<32x8xf32>
    %c56 = arith.constant 56 : index
    %c0_27 = arith.constant 0 : index
    %98 = vector.load %arg2[%c56, %c0_27] : memref<328x128xf32, #tpu.memory_space<vmem>>, vector<8x64xf32>
    %cst_28 = arith.constant dense<0.000000e+00> : vector<32x64xf32>
    %99 = tpu.matmul %97, %98, %cst_28 {dimension_numbers = #tpu.dot_dimension_numbers<[1], [0], [0], [1], [0, 0, 1, 1], [], []>} : vector<32x8xf32>, vector<8x64xf32>, vector<32x64xf32> -> vector<32x64xf32>
    %c72 = arith.constant 72 : index
    %c0_29 = arith.constant 0 : index
    %100 = vector.load %arg2[%c72, %c0_29] : memref<328x128xf32, #tpu.memory_space<vmem>>, vector<1x64xf32>
    %101 = vector.broadcast %100 : vector<1x64xf32> to vector<32x64xf32>
    %102 = arith.mulf %99, %101 : vector<32x64xf32>
    %103 = math.exp %102 : vector<32x64xf32>
    %104 = arith.mulf %97, %79 : vector<32x8xf32>
    %c56_30 = arith.constant 56 : index
    %c0_31 = arith.constant 0 : index
    %105 = vector.load %arg2[%c56_30, %c0_31] : memref<328x128xf32, #tpu.memory_space<vmem>>, vector<8x64xf32>
    %cst_32 = arith.constant dense<0.000000e+00> : vector<32x64xf32>
    %106 = tpu.matmul %104, %105, %cst_32 {dimension_numbers = #tpu.dot_dimension_numbers<[1], [0], [0], [1], [0, 0, 1, 1], [], []>} : vector<32x8xf32>, vector<8x64xf32>, vector<32x64xf32> -> vector<32x64xf32>
    %c64 = arith.constant 64 : index
    %c0_33 = arith.constant 0 : index
    %107 = vector.load %arg2[%c64, %c0_33] : memref<328x128xf32, #tpu.memory_space<vmem>>, vector<8x64xf32>
    %cst_34 = arith.constant dense<0.000000e+00> : vector<32x64xf32>
    %108 = tpu.matmul %82, %107, %cst_34 {dimension_numbers = #tpu.dot_dimension_numbers<[1], [0], [0], [1], [0, 0, 1, 1], [], []>} : vector<32x8xf32>, vector<8x64xf32>, vector<32x64xf32> -> vector<32x64xf32>
    %109 = arith.mulf %106, %108 : vector<32x64xf32>
    %c64_35 = arith.constant 64 : index
    %c0_36 = arith.constant 0 : index
    %110 = vector.load %arg2[%c64_35, %c0_36] : memref<328x128xf32, #tpu.memory_space<vmem>>, vector<8x64xf32>
    %cst_37 = arith.constant dense<0.000000e+00> : vector<32x64xf32>
    %111 = tpu.matmul %83, %110, %cst_37 {dimension_numbers = #tpu.dot_dimension_numbers<[1], [0], [0], [1], [0, 0, 1, 1], [], []>} : vector<32x8xf32>, vector<8x64xf32>, vector<32x64xf32> -> vector<32x64xf32>
    %cst_38 = arith.constant 0.000000e+00 : f32
    %112 = vector.broadcast %cst_38 : f32 to vector<1x64xf32>
    %113 = vector.extract_strided_slice %109 {offsets = [0, 0], sizes = [31, 64], strides = [1, 1]} : vector<32x64xf32> to vector<31x64xf32>
    %114 = tpu.concatenate %112, %113 in 0 : vector<1x64xf32>, vector<31x64xf32> -> vector<32x64xf32>
    %c1_i32_39 = arith.constant 1 : i32
    %115 = vector.broadcast %c1_i32_39 : i32 to vector<32x64xi32>
    %116 = arith.cmpi sge, %13, %115 : vector<32x64xi32>
    %cst_40 = arith.constant 0.000000e+00 : f32
    %117 = vector.broadcast %cst_40 : f32 to vector<32x64xf32>
    %118 = arith.select %116, %114, %117 : vector<32x64xi1>, vector<32x64xf32>
    %119 = arith.mulf %103, %118 : vector<32x64xf32>
    %120 = arith.addf %119, %109 : vector<32x64xf32>
    %cst_41 = arith.constant 1.000000e+00 : f32
    %121 = vector.broadcast %cst_41 : f32 to vector<1x64xf32>
    %122 = vector.extract_strided_slice %103 {offsets = [0, 0], sizes = [31, 64], strides = [1, 1]} : vector<32x64xf32> to vector<31x64xf32>
    %123 = tpu.concatenate %121, %122 in 0 : vector<1x64xf32>, vector<31x64xf32> -> vector<32x64xf32>
    %c1_i32_42 = arith.constant 1 : i32
    %124 = vector.broadcast %c1_i32_42 : i32 to vector<32x64xi32>
    %125 = arith.cmpi sge, %13, %124 : vector<32x64xi32>
    %cst_43 = arith.constant 1.000000e+00 : f32
    %126 = vector.broadcast %cst_43 : f32 to vector<32x64xf32>
    %127 = arith.select %125, %123, %126 : vector<32x64xi1>, vector<32x64xf32>
    %128 = arith.mulf %103, %127 : vector<32x64xf32>
    %cst_44 = arith.constant 0.000000e+00 : f32
    %129 = vector.broadcast %cst_44 : f32 to vector<2x64xf32>
    %130 = vector.extract_strided_slice %120 {offsets = [0, 0], sizes = [30, 64], strides = [1, 1]} : vector<32x64xf32> to vector<30x64xf32>
    %131 = tpu.concatenate %129, %130 in 0 : vector<2x64xf32>, vector<30x64xf32> -> vector<32x64xf32>
    %c2_i32_45 = arith.constant 2 : i32
    %132 = vector.broadcast %c2_i32_45 : i32 to vector<32x64xi32>
    %133 = arith.cmpi sge, %13, %132 : vector<32x64xi32>
    %cst_46 = arith.constant 0.000000e+00 : f32
    %134 = vector.broadcast %cst_46 : f32 to vector<32x64xf32>
    %135 = arith.select %133, %131, %134 : vector<32x64xi1>, vector<32x64xf32>
    %136 = arith.mulf %128, %135 : vector<32x64xf32>
    %137 = arith.addf %136, %120 : vector<32x64xf32>
    %cst_47 = arith.constant 1.000000e+00 : f32
    %138 = vector.broadcast %cst_47 : f32 to vector<2x64xf32>
    %139 = vector.extract_strided_slice %128 {offsets = [0, 0], sizes = [30, 64], strides = [1, 1]} : vector<32x64xf32> to vector<30x64xf32>
    %140 = tpu.concatenate %138, %139 in 0 : vector<2x64xf32>, vector<30x64xf32> -> vector<32x64xf32>
    %c2_i32_48 = arith.constant 2 : i32
    %141 = vector.broadcast %c2_i32_48 : i32 to vector<32x64xi32>
    %142 = arith.cmpi sge, %13, %141 : vector<32x64xi32>
    %cst_49 = arith.constant 1.000000e+00 : f32
    %143 = vector.broadcast %cst_49 : f32 to vector<32x64xf32>
    %144 = arith.select %142, %140, %143 : vector<32x64xi1>, vector<32x64xf32>
    %145 = arith.mulf %128, %144 : vector<32x64xf32>
    %cst_50 = arith.constant 0.000000e+00 : f32
    %146 = vector.broadcast %cst_50 : f32 to vector<4x64xf32>
    %147 = vector.extract_strided_slice %137 {offsets = [0, 0], sizes = [28, 64], strides = [1, 1]} : vector<32x64xf32> to vector<28x64xf32>
    %148 = tpu.concatenate %146, %147 in 0 : vector<4x64xf32>, vector<28x64xf32> -> vector<32x64xf32>
    %c4_i32 = arith.constant 4 : i32
    %149 = vector.broadcast %c4_i32 : i32 to vector<32x64xi32>
    %150 = arith.cmpi sge, %13, %149 : vector<32x64xi32>
    %cst_51 = arith.constant 0.000000e+00 : f32
    %151 = vector.broadcast %cst_51 : f32 to vector<32x64xf32>
    %152 = arith.select %150, %148, %151 : vector<32x64xi1>, vector<32x64xf32>
    %153 = arith.mulf %145, %152 : vector<32x64xf32>
    %154 = arith.addf %153, %137 : vector<32x64xf32>
    %cst_52 = arith.constant 1.000000e+00 : f32
    %155 = vector.broadcast %cst_52 : f32 to vector<4x64xf32>
    %156 = vector.extract_strided_slice %145 {offsets = [0, 0], sizes = [28, 64], strides = [1, 1]} : vector<32x64xf32> to vector<28x64xf32>
    %157 = tpu.concatenate %155, %156 in 0 : vector<4x64xf32>, vector<28x64xf32> -> vector<32x64xf32>
    %c4_i32_53 = arith.constant 4 : i32
    %158 = vector.broadcast %c4_i32_53 : i32 to vector<32x64xi32>
    %159 = arith.cmpi sge, %13, %158 : vector<32x64xi32>
    %cst_54 = arith.constant 1.000000e+00 : f32
    %160 = vector.broadcast %cst_54 : f32 to vector<32x64xf32>
    %161 = arith.select %159, %157, %160 : vector<32x64xi1>, vector<32x64xf32>
    %162 = arith.mulf %145, %161 : vector<32x64xf32>
    %cst_55 = arith.constant 0.000000e+00 : f32
    %163 = vector.broadcast %cst_55 : f32 to vector<8x64xf32>
    %164 = vector.extract_strided_slice %154 {offsets = [0, 0], sizes = [24, 64], strides = [1, 1]} : vector<32x64xf32> to vector<24x64xf32>
    %165 = tpu.concatenate %163, %164 in 0 : vector<8x64xf32>, vector<24x64xf32> -> vector<32x64xf32>
    %c8_i32 = arith.constant 8 : i32
    %166 = vector.broadcast %c8_i32 : i32 to vector<32x64xi32>
    %167 = arith.cmpi sge, %13, %166 : vector<32x64xi32>
    %cst_56 = arith.constant 0.000000e+00 : f32
    %168 = vector.broadcast %cst_56 : f32 to vector<32x64xf32>
    %169 = arith.select %167, %165, %168 : vector<32x64xi1>, vector<32x64xf32>
    %170 = arith.mulf %162, %169 : vector<32x64xf32>
    %171 = arith.addf %170, %154 : vector<32x64xf32>
    %172 = arith.mulf %171, %111 : vector<32x64xf32>
    %c88 = arith.constant 88 : index
    %c0_57 = arith.constant 0 : index
    %173 = vector.load %arg2[%c88, %c0_57] : memref<328x128xf32, #tpu.memory_space<vmem>>, vector<64x8xf32>
    %cst_58 = arith.constant dense<0.000000e+00> : vector<32x8xf32>
    %174 = tpu.matmul %172, %173, %cst_58 {dimension_numbers = #tpu.dot_dimension_numbers<[1], [0], [0], [1], [0, 0, 1, 1], [], []>} : vector<32x64xf32>, vector<64x8xf32>, vector<32x8xf32> -> vector<32x8xf32>
    %c80 = arith.constant 80 : index
    %c0_59 = arith.constant 0 : index
    %175 = vector.load %arg2[%c80, %c0_59] : memref<328x128xf32, #tpu.memory_space<vmem>>, vector<1x8xf32>
    %176 = vector.broadcast %175 : vector<1x8xf32> to vector<32x8xf32>
    %177 = arith.mulf %79, %176 : vector<32x8xf32>
    %178 = arith.addf %174, %177 : vector<32x8xf32>
    %179 = arith.negf %30 : vector<32x8xf32>
    %180 = math.exp %179 : vector<32x8xf32>
    %cst_60 = arith.constant 1.000000e+00 : f32
    %181 = vector.broadcast %cst_60 : f32 to vector<32x8xf32>
    %182 = arith.addf %181, %180 : vector<32x8xf32>
    %183 = arith.divf %181, %182 : vector<32x8xf32>
    %184 = arith.mulf %30, %183 : vector<32x8xf32>
    %185 = arith.mulf %178, %184 : vector<32x8xf32>
    %c152 = arith.constant 152 : index
    %c0_61 = arith.constant 0 : index
    %186 = vector.load %arg2[%c152, %c0_61] : memref<328x128xf32, #tpu.memory_space<vmem>>, vector<8x4xf32>
    %cst_62 = arith.constant dense<0.000000e+00> : vector<32x4xf32>
    %187 = tpu.matmul %185, %186, %cst_62 {dimension_numbers = #tpu.dot_dimension_numbers<[1], [0], [0], [1], [0, 0, 1, 1], [], []>} : vector<32x8xf32>, vector<8x4xf32>, vector<32x4xf32> -> vector<32x4xf32>
    %188 = arith.addf %187, %10 : vector<32x4xf32>
    %189 = vector.extract_strided_slice %188 {offsets = [0, 0], sizes = [16, 4], strides = [1, 1]} : vector<32x4xf32> to vector<16x4xf32>
    %190 = vector.extract_strided_slice %188 {offsets = [16, 0], sizes = [16, 4], strides = [1, 1]} : vector<32x4xf32> to vector<16x4xf32>
    %191 = tpu.concatenate %189, %190 in 1 : vector<16x4xf32>, vector<16x4xf32> -> vector<16x8xf32>
    %c224 = arith.constant 224 : index
    %c0_63 = arith.constant 0 : index
    %192 = vector.load %arg2[%c224, %c0_63] : memref<328x128xf32, #tpu.memory_space<vmem>>, vector<32x8xf32>
    %193 = vector.extract_strided_slice %192 {offsets = [0, 0], sizes = [32, 1], strides = [1, 1]} : vector<32x8xf32> to vector<32x1xf32>
    %194 = vector.extract_strided_slice %192 {offsets = [0, 1], sizes = [32, 1], strides = [1, 1]} : vector<32x8xf32> to vector<32x1xf32>
    %195 = vector.extract_strided_slice %192 {offsets = [0, 2], sizes = [32, 2], strides = [1, 1]} : vector<32x8xf32> to vector<32x2xf32>
    %196 = vector.extract_strided_slice %192 {offsets = [0, 4], sizes = [32, 4], strides = [1, 1]} : vector<32x8xf32> to vector<32x4xf32>
    %c288 = arith.constant 288 : index
    %c0_64 = arith.constant 0 : index
    %197 = vector.load %arg2[%c288, %c0_64] : memref<328x128xf32, #tpu.memory_space<vmem>>, vector<32x32xf32>
    %c160 = arith.constant 160 : index
    %c0_65 = arith.constant 0 : index
    %198 = vector.load %arg2[%c160, %c0_65] : memref<328x128xf32, #tpu.memory_space<vmem>>, vector<32x16xf32>
    %cst_66 = arith.constant dense<0.000000e+00> : vector<32x8xf32>
    %199 = tpu.matmul %198, %191, %cst_66 {dimension_numbers = #tpu.dot_dimension_numbers<[1], [0], [0], [1], [0, 0, 1, 1], [], []>} : vector<32x16xf32>, vector<16x8xf32>, vector<32x8xf32> -> vector<32x8xf32>
    %c192 = arith.constant 192 : index
    %c0_67 = arith.constant 0 : index
    %200 = vector.load %arg2[%c192, %c0_67] : memref<328x128xf32, #tpu.memory_space<vmem>>, vector<32x16xf32>
    %cst_68 = arith.constant dense<0.000000e+00> : vector<32x8xf32>
    %201 = tpu.matmul %200, %191, %cst_68 {dimension_numbers = #tpu.dot_dimension_numbers<[1], [0], [0], [1], [0, 0, 1, 1], [], []>} : vector<32x16xf32>, vector<16x8xf32>, vector<32x8xf32> -> vector<32x8xf32>
    %202 = vector.broadcast %193 : vector<32x1xf32> to vector<32x8xf32>
    %203 = arith.addf %201, %202 : vector<32x8xf32>
    %c256 = arith.constant 256 : index
    %c0_69 = arith.constant 0 : index
    %204 = vector.load %arg2[%c256, %c0_69] : memref<328x128xf32, #tpu.memory_space<vmem>>, vector<32x32xf32>
    %cst_70 = arith.constant dense<0.000000e+00> : vector<32x8xf32>
    %205 = tpu.matmul %204, %199, %cst_70 {dimension_numbers = #tpu.dot_dimension_numbers<[1], [0], [0], [1], [0, 0, 1, 1], [], []>} : vector<32x32xf32>, vector<32x8xf32>, vector<32x8xf32> -> vector<32x8xf32>
    %c0_71 = arith.constant 0 : index
    %206 = memref.load %arg3[%c0_71] : memref<4xf32, #tpu.memory_space<smem>>
    %207 = vector.broadcast %206 : f32 to vector<32x8xf32>
    %208 = arith.mulf %207, %205 : vector<32x8xf32>
    %209 = vector.extract_strided_slice %196 {offsets = [0, 0], sizes = [32, 1], strides = [1, 1]} : vector<32x4xf32> to vector<32x1xf32>
    %210 = vector.broadcast %209 : vector<32x1xf32> to vector<32x8xf32>
    %211 = arith.addf %208, %210 : vector<32x8xf32>
    %212 = math.tanh %211 : vector<32x8xf32>
    %c1_72 = arith.constant 1 : index
    %213 = memref.load %arg3[%c1_72] : memref<4xf32, #tpu.memory_space<smem>>
    %214 = vector.broadcast %213 : f32 to vector<32x8xf32>
    %215 = arith.mulf %214, %205 : vector<32x8xf32>
    %216 = vector.extract_strided_slice %196 {offsets = [0, 1], sizes = [32, 1], strides = [1, 1]} : vector<32x4xf32> to vector<32x1xf32>
    %217 = vector.broadcast %216 : vector<32x1xf32> to vector<32x8xf32>
    %218 = arith.addf %215, %217 : vector<32x8xf32>
    %cst_73 = arith.constant dense<0.000000e+00> : vector<32x8xf32>
    %219 = tpu.matmul %197, %212, %cst_73 {dimension_numbers = #tpu.dot_dimension_numbers<[1], [0], [0], [1], [0, 0, 1, 1], [], []>} : vector<32x32xf32>, vector<32x8xf32>, vector<32x8xf32> -> vector<32x8xf32>
    %220 = arith.addf %218, %219 : vector<32x8xf32>
    %221 = math.tanh %220 : vector<32x8xf32>
    %c2 = arith.constant 2 : index
    %222 = memref.load %arg3[%c2] : memref<4xf32, #tpu.memory_space<smem>>
    %223 = vector.broadcast %222 : f32 to vector<32x8xf32>
    %224 = arith.mulf %223, %205 : vector<32x8xf32>
    %225 = vector.extract_strided_slice %196 {offsets = [0, 2], sizes = [32, 1], strides = [1, 1]} : vector<32x4xf32> to vector<32x1xf32>
    %226 = vector.broadcast %225 : vector<32x1xf32> to vector<32x8xf32>
    %227 = arith.addf %224, %226 : vector<32x8xf32>
    %cst_74 = arith.constant dense<0.000000e+00> : vector<32x8xf32>
    %228 = tpu.matmul %197, %221, %cst_74 {dimension_numbers = #tpu.dot_dimension_numbers<[1], [0], [0], [1], [0, 0, 1, 1], [], []>} : vector<32x32xf32>, vector<32x8xf32>, vector<32x8xf32> -> vector<32x8xf32>
    %229 = arith.addf %227, %228 : vector<32x8xf32>
    %230 = math.tanh %229 : vector<32x8xf32>
    %c3 = arith.constant 3 : index
    %231 = memref.load %arg3[%c3] : memref<4xf32, #tpu.memory_space<smem>>
    %232 = vector.broadcast %231 : f32 to vector<32x8xf32>
    %233 = arith.mulf %232, %205 : vector<32x8xf32>
    %234 = vector.extract_strided_slice %196 {offsets = [0, 3], sizes = [32, 1], strides = [1, 1]} : vector<32x4xf32> to vector<32x1xf32>
    %235 = vector.broadcast %234 : vector<32x1xf32> to vector<32x8xf32>
    %236 = arith.addf %233, %235 : vector<32x8xf32>
    %cst_75 = arith.constant dense<0.000000e+00> : vector<32x8xf32>
    %237 = tpu.matmul %197, %230, %cst_75 {dimension_numbers = #tpu.dot_dimension_numbers<[1], [0], [0], [1], [0, 0, 1, 1], [], []>} : vector<32x32xf32>, vector<32x8xf32>, vector<32x8xf32> -> vector<32x8xf32>
    %238 = arith.addf %236, %237 : vector<32x8xf32>
    %239 = math.tanh %238 : vector<32x8xf32>
    %240 = arith.addf %239, %203 : vector<32x8xf32>
    %cst_76 = arith.constant dense<0.000000e+00> : vector<32x8xf32>
    %241 = tpu.matmul %197, %240, %cst_76 {dimension_numbers = #tpu.dot_dimension_numbers<[1], [0], [0], [1], [0, 0, 1, 1], [], []>} : vector<32x32xf32>, vector<32x8xf32>, vector<32x8xf32> -> vector<32x8xf32>
    %242 = vector.broadcast %194 : vector<32x1xf32> to vector<32x8xf32>
    %243 = arith.addf %241, %242 : vector<32x8xf32>
    %c320 = arith.constant 320 : index
    %c0_77 = arith.constant 0 : index
    %244 = vector.load %arg2[%c320, %c0_77] : memref<328x128xf32, #tpu.memory_space<vmem>>, vector<4x33xf32>
    %245 = vector.extract_strided_slice %244 {offsets = [0, 0], sizes = [4, 32], strides = [1, 1]} : vector<4x33xf32> to vector<4x32xf32>
    %246 = vector.extract_strided_slice %244 {offsets = [0, 32], sizes = [4, 1], strides = [1, 1]} : vector<4x33xf32> to vector<4x1xf32>
    %247 = vector.extract_strided_slice %195 {offsets = [0, 0], sizes = [32, 1], strides = [1, 1]} : vector<32x2xf32> to vector<32x1xf32>
    %248 = vector.broadcast %247 : vector<32x1xf32> to vector<32x8xf32>
    %249 = arith.addf %243, %248 : vector<32x8xf32>
    %250 = math.tanh %249 : vector<32x8xf32>
    %cst_78 = arith.constant dense<0.000000e+00> : vector<4x8xf32>
    %251 = tpu.matmul %245, %250, %cst_78 {dimension_numbers = #tpu.dot_dimension_numbers<[1], [0], [0], [1], [0, 0, 1, 1], [], []>} : vector<4x32xf32>, vector<32x8xf32>, vector<4x8xf32> -> vector<4x8xf32>
    %252 = vector.broadcast %246 : vector<4x1xf32> to vector<4x8xf32>
    %253 = arith.addf %251, %252 : vector<4x8xf32>
    %254 = vector.extract_strided_slice %195 {offsets = [0, 1], sizes = [32, 1], strides = [1, 1]} : vector<32x2xf32> to vector<32x1xf32>
    %255 = vector.broadcast %254 : vector<32x1xf32> to vector<32x8xf32>
    %256 = arith.addf %243, %255 : vector<32x8xf32>
    %257 = math.tanh %256 : vector<32x8xf32>
    %cst_79 = arith.constant dense<0.000000e+00> : vector<4x8xf32>
    %258 = tpu.matmul %245, %257, %cst_79 {dimension_numbers = #tpu.dot_dimension_numbers<[1], [0], [0], [1], [0, 0, 1, 1], [], []>} : vector<4x32xf32>, vector<32x8xf32>, vector<4x8xf32> -> vector<4x8xf32>
    %259 = vector.broadcast %246 : vector<4x1xf32> to vector<4x8xf32>
    %260 = arith.addf %258, %259 : vector<4x8xf32>
    %261 = tpu.concatenate %253, %260 in 0 : vector<4x8xf32>, vector<4x8xf32> -> vector<8x8xf32>
    %262 = vector.extract_strided_slice %261 {offsets = [0, 0], sizes = [8, 4], strides = [1, 1]} : vector<8x8xf32> to vector<8x4xf32>
    %263 = vector.broadcast %2 : vector<1x4xf32> to vector<8x4xf32>
    %264 = arith.addf %262, %263 : vector<8x4xf32>
    %c0_80 = arith.constant 0 : index
    %c0_81 = arith.constant 0 : index
    %c0_82 = arith.constant 0 : index
    %265 = vector.load %arg4[%c0_80, %c0_81, %c0_82] : memref<2x8x4xf32, #tpu.memory_space<vmem>>, vector<1x8x4xf32>
    %266 = vector.shape_cast %265 : vector<1x8x4xf32> to vector<8x4xf32>
    %267 = vector.shape_cast %264 : vector<8x4xf32> to vector<1x8x4xf32>
    tpu.vector_store %arg4[%c0_80, %c0_81, %c0_82], %267 {strides = array<i32>} : memref<2x8x4xf32, #tpu.memory_space<vmem>>, vector<1x8x4xf32>,
    %268 = vector.extract_strided_slice %261 {offsets = [0, 4], sizes = [8, 4], strides = [1, 1]} : vector<8x8xf32> to vector<8x4xf32>
    %269 = vector.broadcast %7 : vector<1x4xf32> to vector<8x4xf32>
    %270 = arith.addf %268, %269 : vector<8x4xf32>
    %c1_83 = arith.constant 1 : index
    %c0_84 = arith.constant 0 : index
    %c0_85 = arith.constant 0 : index
    %271 = vector.load %arg4[%c1_83, %c0_84, %c0_85] : memref<2x8x4xf32, #tpu.memory_space<vmem>>, vector<1x8x4xf32>
    %272 = vector.shape_cast %271 : vector<1x8x4xf32> to vector<8x4xf32>
    %273 = vector.shape_cast %270 : vector<8x4xf32> to vector<1x8x4xf32>
    tpu.vector_store %arg4[%c1_83, %c0_84, %c0_85], %273 {strides = array<i32>} : memref<2x8x4xf32, #tpu.memory_space<vmem>>, vector<1x8x4xf32>,
    return
  }
  func.func @transform_0(%arg0: i32) -> (i32, i32, i32) {
    %c0_i32 = arith.constant 0 : i32
    %c0_i32_0 = arith.constant 0 : i32
    %c0_i32_1 = arith.constant 0 : i32
    return %arg0, %c0_i32, %c0_i32_0 : i32, i32, i32
  }
  func.func @transform_1(%arg0: i32) -> (i32, i32) {
    %c0_i32 = arith.constant 0 : i32
    %c0_i32_0 = arith.constant 0 : i32
    %c0_i32_1 = arith.constant 0 : i32
    return %c0_i32, %c0_i32_0 : i32, i32
  }
  func.func @transform_2(%arg0: i32) -> i32 {
    %c0_i32 = arith.constant 0 : i32
    %c0_i32_0 = arith.constant 0 : i32
    return %c0_i32 : i32
  }
  func.func @transform_3(%arg0: i32) -> (i32, i32, i32) {
    %c0_i32 = arith.constant 0 : i32
    %c0_i32_0 = arith.constant 0 : i32
    %c0_i32_1 = arith.constant 0 : i32
    return %arg0, %c0_i32, %c0_i32_0 : i32, i32, i32
  }
}

</mosaic_0001>

<bundles_post_ra>
// kernel: _lambda_.1
= control target key start
LH: loop header
LB: loop body
LE: loop exit
PB: predicated region body
PF: predicated region fallthrough
CT: control target
= control target key end

     0   :  { %8 = vsyncpa [#allocation3], 0  ;;  %s3563_s0 = inlined_call_operand.vmem [shape: f32[2,16,4], index: 0, kind: input, shape index: {}]   ;;  %s3564_s1 = inlined_call_operand.hbm [shape: f32[328,128], index: 1, kind: input, shape index: {}]   ;;  %s3565_s2 = inlined_call_operand.vmem [shape: f32[4], index: 2, kind: input, shape index: {}]   ;;  %s3566_s3 = inlined_call_operand.vmem [shape: f32[2,8,4], index: 3, kind: output, shape index: {}]  }
   0x1   :  { %9 = vsyncpa [#allocation4], 0  ;;  %s3093_s12 = smov [#allocation2]   ;;  %s30_s16 = sshll.u32 %s3565_s2, 4  ;;  %s31_s16 = int_to_ptr.vmem [resolvable:$true] %s30_s16 }
   0x2   :  { %s17_s13 = sshll.u32 %s3093_s12, 4  ;;  %s18_s13 = int_to_ptr.vmem [resolvable:$true] %s17_s13 }
   0x3   :  { %s3065_s17 = scalar_lea.vmem %s18_s13, 5248  ;;  %p3070_p1 = scmp.lt.s32.totalorder %s18_s13, %s18_s13 }
   0x4   :  { %p3066_p0 = scmp.ne.s32.totalorder %s18_s13, %s3065_s17  ;;  %p3071_p2 = scmp.lt.s32.totalorder %s3065_s17, %s3065_s17 }
   0x6   :  { %p3072_p3 = por %p3071_p2, %p3070_p1 }
   0x8   :  { %p3073_p4 = pnand %p3072_p3, %p3066_p0 }
   0xa   :  { %3076 = shalt.err (!%p3073_p4)
}
   0xb   :  { %s3094_s18 = smov 128   ;;  %s3095_s19 = smov 8  }
   0xc   :  { %23 = dma.hbm_to_vmem [thread:$0]  %s3564_s1, 5248, %s18_s13, [#allocation3], %s3094_s18, %s3094_s18, %s3095_s19  }
   0xd   :  { %s3077_s22 = scalar_lea.vmem %s31_s16, 16  ;;  %p3082_p6 = scmp.lt.s32.totalorder %s31_s16, %s31_s16 }
   0xe   :  { %p3078_p5 = scmp.ne.s32.totalorder %s31_s16, %s3077_s22  ;;  %p3083_p7 = scmp.lt.s32.totalorder %s3077_s22, %s3077_s22 }
  0x10   :  { %p3084_p8 = por %p3083_p7, %p3082_p6 }
  0x12   :  { %p3085_p9 = pnand %p3084_p8, %p3078_p5 }
  0x14   :  { %3088 = shalt.err (!%p3085_p9)
}
  0x15   :  { %s3096_s2 = smov [#allocation5]  }
  0x16   :  { %33 = dma.vmem_to_smem %s31_s16, 16, %s3096_s2, [#allocation4]  }
  0x17   :  { %3089 = dma.done.wait [#allocation3], 5248  }
  0x18   :  { %3090 = vsyncadd [#allocation3], 4294962048 }
  0x19   :  { %3091 = dma.done.wait [#allocation4], 16  }
  0x1a   :  { %3092 = vsyncadd [#allocation4], 4294967280 }
  0x1b   :  { %40 = sfence }
  0x1c   :  { %v43_v0 = vlaneseq  ;;  %v2508_v2 = vld [vmem:[%s3563_s0 + $0x18] sm:$0xff]  ;;  %v42_v3 = vld [vmem:[%s3563_s0 + $0x8] sm:$0xff]  ;;  %v2507_v5 = vld [vmem:[%s3563_s0 + $0x10] sm:$0xff]  ;;  %vm71_vm0 = vcmask 31744   ;;  %vm123_vm1 = vcmask 1043456   ;;  %vm225_vm2 = vcmask 1040384  }
  0x1d   :  { %v41_v6 = vld [vmem:[%s3563_s0] sm:$0xff]  ;;  %v110_v21 = vld [vmem:[#allocation2 + $0x8] sm:$0xf]  ;;  %v212_v52 = vld [vmem:[#allocation2 + $0x10] sm:$0xf]  ;;  %vm258_vm3 = vcmask 1041408  }
  0x1e   :  { %v3137_v1 = vshrl.u32 %v43_v0, 7  ;;  %2707 = vmatprep.subr.msk.mxu0 %vm123_vm1, %v110_v21  ;;  %2905 = vmatprep.subr.msk.mxu1 %vm123_vm1, %v110_v21  ;;  %v2509_v36 = vld [vmem:[#allocation2] ss:$0 sm:$0xff]  ;;  %v460_v48 = vld [vmem:[#allocation2 + $0x28] sm:$0xff]  ;;  %vm291_vm6 = vcmask 1042432   ;;  %vm362_vm11 = vcmask 64512  }
  0x1f   :  { %2708 = vmatpush3.msk.msra.mxu0 %vm123_vm1, %v110_v21  ;;  %2906 = vmatpush3.msk.msra.mxu1 %vm123_vm1, %v110_v21  ;;  %v361_v47 = vld [vmem:[#allocation2 + $0x20] sm:$0xff]  ;;  %s3097_s0 = smov 120   ;;  %s3098_s30 = smov 4  }
  0x20   :  { %v45_v4 = vsub.s32 7, %v3137_v1  ;;  %2715 = vmatprep.subr.mxu1 %v361_v47  ;;  %2723 = vmatprep.subr.mxu0 %v460_v48  ;;  %v61_v49 = vadd.s32 16, %v3137_v1  ;;  %v215_v50 = vsub.s32 0, %v3137_v1  ;;  %v248_v51 = vsub.s32 1, %v3137_v1  ;;  %s1784_s4 = sld [smem:[#allocation5]]  ;;  %s3110_s10 = smov 124  }
  0x21   :  { %v3196_v53 = vand.u32 15, %v3137_v1  ;;  %v281_v54 = vsub.s32 2, %v3137_v1  ;;  %v314_v55 = vsub.s32 3, %v3137_v1  ;;  %s2571_s5 = sld [smem:[#allocation5 + $0x1]] }
  0x22   :  { %v3152_v7 = vrot.slane %v2508_v2, %v45_v4  ;;  %v3154_v8 = vrot.slane %v42_v3, %v45_v4  ;;  %v3200_v56 = vand.u32 15, %v61_v49  ;;  %v216_v57 = vrot.slane %v212_v52, %v215_v50  ;;  %s2576_s6 = sld [smem:[#allocation5 + $0x2]] }
  0x23   :  { %v249_v59 = vrot.slane %v212_v52, %v248_v51  ;;  %vm238_vm4 = vcmp.ge.s32.totalorder %v3196_v53, 1  ;;  %vm271_vm5 = vcmp.ge.s32.totalorder %v3196_v53, 2  ;;  %v282_v61 = vrot.slane %v212_v52, %v281_v54  ;;  %v2515_v51 = vld [vmem:[#allocation2 + $0x18] ss:$0 sm:$0xff]  ;;  %s2581_s7 = sld [smem:[#allocation5 + $0x3]] }
  0x24   :  { %v3157_v9 = vsub.f32 %v2507_v5, %v3152_v7  ;;  %v3160_v10 = vsub.f32 %v41_v6, %v3154_v8  ;;  %v3163_v11 = vsub.f32 %v2508_v2, %v3152_v7  ;;  %v3166_v12 = vsub.f32 %v42_v3, %v3154_v8 }
  0x25   :  { %v3208_v62 = vrot.slane %v212_v52, %v314_v55  ;;  %vm240_vm7 = vcmp.ge.s32.totalorder %v3200_v56, 1  ;;  %vm304_vm8 = vcmp.ge.s32.totalorder %v3196_v53, 3  ;;  %vm273_vm9 = vcmp.ge.s32.totalorder %v3200_v56, 2 }
  0x26   :  { %v69_v13 = vmul.f32 %v3157_v9, %v3157_v9  ;;  %v67_v14 = vmul.f32 %v3160_v10, %v3160_v10  ;;  %v70_v15 = vmul.f32 %v3163_v11, %v3163_v11  ;;  %v68_v16 = vmul.f32 %v3166_v12, %v3166_v12 }
  0x27   :  { %vm306_vm10 = vcmp.ge.s32.totalorder %v3200_v56, 3 }
  0x28   :  { %v78_v17 = vsel %vm71_vm0, %v69_v13, 0.0  ;;  %v72_v18 = vsel %vm71_vm0, %v67_v14, 0.0  ;;  %v81_v19 = vsel %vm71_vm0, %v70_v15, 0.0  ;;  %v75_v20 = vsel %vm71_vm0, %v68_v16, 0.0 }
  0x29   :  { %79 = vadd.xlane.f32.xlu1 %v78_v17  ;;  %73 = vadd.xlane.f32.xlu0 %v72_v18 }
  0x2d   :  { %82 = vadd.xlane.f32.xlu1 %v81_v19  ;;  %76 = vadd.xlane.f32.xlu0 %v75_v20 }
  0xb2   :  { %v80_v22 = vpop.xlane.xlu1 %79  ;;  %v74_v23 = vpop.xlane.xlu0 %73 }
  0xb3   :  { %v87_v24 = vmul.f32 0.25, %v80_v22  ;;  %v85_v25 = vmul.f32 0.25, %v74_v23 }
  0xb5   :  { %v91_v26 = vadd.f32 1e-05, %v87_v24  ;;  %v89_v27 = vadd.f32 1e-05, %v85_v25 }
  0xb6   :  { %v83_v28 = vpop.xlane.xlu1 %82  ;;  %v77_v29 = vpop.xlane.xlu0 %76 }
  0xb7   :  { %2945 = vrsqrt.f32 %v91_v26  ;;  %v88_v30 = vmul.f32 0.25, %v83_v28  ;;  %v86_v31 = vmul.f32 0.25, %v77_v29 }
  0xb8   :  { %2947 = vrsqrt.f32 %v89_v27 }
  0xb9   :  { %v92_v32 = vadd.f32 1e-05, %v88_v30  ;;  %v90_v33 = vadd.f32 1e-05, %v86_v31 }
  0xbb   :  { %2949 = vrsqrt.f32 %v92_v32 }
  0xbc   :  { %2951 = vrsqrt.f32 %v90_v33 }
  0xc4   :  { %v2946_v34 = vpop.eup %2945 }
  0xc5   :  { %v2948_v35 = vpop.eup %2947  ;;  %v99_v37 = vmul.f32 %v2946_v34, %v3157_v9 }
  0xc6   :  { %v97_v38 = vmul.f32 %v2948_v35, %v3160_v10 }
  0xc7   :  { %v108_v39 = vmul.f32 %v2509_v36, %v99_v37 }
  0xc8   :  { %v2950_v40 = vpop.eup %2949  ;;  %v106_v41 = vmul.f32 %v2509_v36, %v97_v38 }
  0xc9   :  { %v2952_v42 = vpop.eup %2951  ;;  %2712 = vmatprep.mubr.msk.f32.mxu1 %vm71_vm0, %v108_v39  ;;  %v100_v43 = vmul.f32 %v2950_v40, %v3163_v11 }
  0xca   :  { %2709 = vmatprep.mubr.msk.f32.mxu0 %vm71_vm0, %v106_v41  ;;  %v98_v44 = vmul.f32 %v2952_v42, %v3166_v12 }
  0xcb   :  { %v109_v45 = vmul.f32 %v2509_v36, %v100_v43 }
  0xcc   :  { %v107_v46 = vmul.f32 %v2509_v36, %v98_v44 }
  0xcd   :  { %2713 = vmatmul.mubr.msk.f32.vlgmr.msra.gmra.mxu1 %vm71_vm0, %v109_v45 }
  0xce   :  { %2710 = vmatmul.mubr.msk.f32.vlgmr.msra.gmra.mxu0 %vm71_vm0, %v107_v46  ;;  %2716 = vmatpush3.msra.mxu1 %v361_v47 }
  0xcf   :  { %2724 = vmatpush3.msra.mxu0 %v460_v48 }
 0x18d   :  { %v3202_v58 = vpop.f32.mrf.mxu1 }
 0x18e   :  { %v3204_v60 = vpop.f32.mrf.mxu0  ;;  %v220_v0 = vmul.f32 %v3202_v58, %v216_v57  ;;  %v231_v1 = vrot.slane %v3202_v58, 7  ;;  %v264_v2 = vrot.slane %v3202_v58, 6  ;;  %v297_v18 = vrot.slane %v3202_v58, 5 }
 0x18f   :  { %v3210_v63 = vpop.f32.mrf.mxu1  ;;  %v227_v5 = vrot.slane %v3204_v60, 7  ;;  %v218_v15 = vmul.f32 %v3204_v60, %v216_v57  ;;  %v260_v16 = vrot.slane %v3204_v60, 6  ;;  %v293_v17 = vrot.slane %v3204_v60, 5 }
 0x190   :  { %v3218_v3 = vpop.f32.mrf.mxu0  ;;  %v229_v4 = vrot.slane %v3210_v63, 7  ;;  %v219_v33 = vmul.f32 %v216_v57, %v3210_v63  ;;  %v262_v38 = vrot.slane %v3210_v63, 6  ;;  %v295_v40 = vrot.slane %v3210_v63, 5 }
 0x191   :  { %v226_v6 = vrot.slane %v3218_v3, 7  ;;  %v259_v13 = vrot.slane %v3218_v3, 6  ;;  %v292_v14 = vrot.slane %v3218_v3, 5  ;;  %v217_v19 = vmul.f32 %v216_v57, %v3218_v3 }
 0x192   :  { %v230_v22 = vsel %vm225_vm2, %v227_v5, %v229_v4  ;;  %v232_v26 = vsel %vm225_vm2, %v229_v4, %v231_v1  ;;  %v263_v45 = vsel %vm258_vm3, %v260_v16, %v262_v38  ;;  %v265_v46 = vsel %vm258_vm3, %v262_v38, %v264_v2  ;;  %v583_v38 = vld [vmem:[#allocation2 + $0x38] sm:$0xff] }
 0x193   :  { %v228_v20 = vsel %vm225_vm2, %v226_v6, %v227_v5  ;;  %v237_v21 = vsel %vm225_vm2, 0.0, %v226_v6  ;;  %v270_v25 = vsel %vm258_vm3, 0.0, %v259_v13  ;;  %v261_v28 = vsel %vm258_vm3, %v259_v13, %v260_v16  ;;  %2731 = vmatprep.subr.mxu1 %v583_v38  ;;  %2739 = vmatprep.subr.mxu0 %v583_v38 }
 0x194   :  { %v242_v23 = vsel %vm238_vm4, %v237_v21, 0.0  ;;  %v251_v24 = vmul.f32 %v249_v59, %v228_v20  ;;  %v275_v29 = vsel %vm271_vm5, %v270_v25, 0.0  ;;  %v303_v30 = vsel %vm291_vm6, 0.0, %v292_v14 }
 0x195   :  { %v250_v27 = vmul.f32 %v249_v59, %v242_v23  ;;  %v294_v32 = vsel %vm291_vm6, %v292_v14, %v293_v17  ;;  %v244_v34 = vsel %vm240_vm7, %v230_v22, 0.0  ;;  %v253_v37 = vmul.f32 %v249_v59, %v232_v26 }
 0x196   :  { %v255_v31 = vadd.f32 %v251_v24, %v218_v15  ;;  %v252_v36 = vmul.f32 %v249_v59, %v244_v34  ;;  %v284_v39 = vmul.f32 %v282_v61, %v261_v28  ;;  %v283_v41 = vmul.f32 %v282_v61, %v275_v29 }
 0x197   :  { %v254_v35 = vadd.f32 %v250_v27, %v217_v19  ;;  %v308_v42 = vsel %vm304_vm8, %v303_v30, 0.0  ;;  %v317_v43 = vmul.f32 %v3208_v62, %v294_v32  ;;  %v277_v50 = vsel %vm273_vm9, %v263_v45, 0.0 }
 0x198   :  { %v256_v44 = vadd.f32 %v252_v36, %v219_v33  ;;  %v316_v48 = vmul.f32 %v3208_v62, %v308_v42  ;;  %v288_v49 = vadd.f32 %v284_v39, %v255_v31  ;;  %v285_v52 = vmul.f32 %v282_v61, %v277_v50  ;;  %v3286_v39 = vld [vmem:[#allocation2 + $0x40] sm:$0xff] }
 0x199   :  { %v287_v47 = vadd.f32 %v283_v41, %v254_v35  ;;  %v296_v54 = vsel %vm291_vm6, %v293_v17, %v295_v40  ;;  %v257_v55 = vadd.f32 %v253_v37, %v220_v0  ;;  %v286_v57 = vmul.f32 %v282_v61, %v265_v46 }
 0x19a   :  { %v321_v1 = vadd.f32 %v317_v43, %v288_v49  ;;  %v310_v4 = vsel %vm306_vm10, %v296_v54, 0.0  ;;  %v298_v2 = vsel %vm291_vm6, %v295_v40, %v297_v18  ;;  %v289_v5 = vadd.f32 %v285_v52, %v256_v44  ;;  %v2524_v52 = vld [vmem:[#allocation2 + $0x30] ss:$0 sm:$0xff] }
 0x19b   :  { %v320_v59 = vadd.f32 %v316_v48, %v287_v47  ;;  %v318_v6 = vmul.f32 %v3208_v62, %v310_v4  ;;  %v290_v13 = vadd.f32 %v286_v57, %v257_v55  ;;  %v319_v14 = vmul.f32 %v3208_v62, %v298_v2 }
 0x19c   :  { %v330_v16 = vadd.f32 %v2515_v51, %v321_v1  ;;  %v2551_v40 = vmul.f32 -1.442695, %v3218_v3  ;;  %v2553_v41 = vmul.f32 -1.442695, %v3210_v63  ;;  %v2552_v42 = vmul.f32 -1.442695, %v3204_v60 }
 0x19d   :  { %v329_v15 = vadd.f32 %v2515_v51, %v320_v59  ;;  %v322_v19 = vadd.f32 %v318_v6, %v289_v5  ;;  %v323_v20 = vadd.f32 %v319_v14, %v290_v13  ;;  %v2554_v43 = vmul.f32 -1.442695, %v3202_v58 }
 0x19e   :  { %v2517_v0 = vmul.f32 -1.442695, %v330_v16  ;;  %vm1686_vm6 = vcmask 261120  }
 0x19f   :  { %v2516_v17 = vmul.f32 -1.442695, %v329_v15  ;;  %v331_v61 = vadd.f32 %v2515_v51, %v322_v19  ;;  %v332_v21 = vadd.f32 %v2515_v51, %v323_v20 }
 0x1a1   :  { %v2518_v22 = vmul.f32 -1.442695, %v331_v61  ;;  %2953 = vpow2.f32 %v2516_v17  ;;  %v2519_v23 = vmul.f32 -1.442695, %v332_v21 }
 0x1a2   :  { %2955 = vpow2.f32 %v2517_v0 }
 0x1a3   :  { %2957 = vpow2.f32 %v2518_v22 }
 0x1a4   :  { %2959 = vpow2.f32 %v2519_v23 }
 0x1ae   :  { %v2954_v18 = vpop.eup %2953 }
 0x1af   :  { %v2956_v24 = vpop.eup %2955  ;;  %v345_v25 = vadd.f32 1.0, %v2954_v18 }
 0x1b0   :  { %v346_v26 = vadd.f32 1.0, %v2956_v24  ;;  %v2958_v27 = vpop.eup %2957 }
 0x1b1   :  { %2961 = vrcp.f32 %v345_v25  ;;  %v2960_v62 = vpop.eup %2959  ;;  %v347_v28 = vadd.f32 1.0, %v2958_v27 }
 0x1b2   :  { %2963 = vrcp.f32 %v346_v26  ;;  %v348_v29 = vadd.f32 1.0, %v2960_v62 }
 0x1b3   :  { %2965 = vrcp.f32 %v347_v28 }
 0x1b4   :  { %2967 = vrcp.f32 %v348_v29 }
 0x1b5   :  { %2969 = vpow2.f32 %v2551_v40 }
 0x1b6   :  { %2971 = vpow2.f32 %v2553_v41 }
 0x1b7   :  { %2973 = vpow2.f32 %v2552_v42 }
 0x1b8   :  { %2975 = vpow2.f32 %v2554_v43 }
 0x1be   :  { %v2962_v30 = vpop.eup %2961 }
 0x1bf   :  { %v2964_v31 = vpop.eup %2963  ;;  %v3262_v32 = vmul.f32 %v2962_v30, %v329_v15 }
 0x1c0   :  { %v3264_v33 = vmul.f32 %v2964_v31, %v330_v16  ;;  %v2966_v34 = vpop.eup %2965 }
 0x1c1   :  { %2717 = vmatprep.mubr.msk.f32.mxu1 %vm362_vm11, %v3262_v32  ;;  %2725 = vmatprep.mubr.msk.f32.mxu0 %vm362_vm11, %v3262_v32  ;;  %v2968_v35 = vpop.eup %2967  ;;  %v3274_v36 = vmul.f32 %v2966_v34, %v331_v61 }
 0x1c2   :  { %2718 = vmatmul.mubr.msk.f32.vlgmr.msra.gmra.mxu1 %vm362_vm11, %v3264_v33  ;;  %2726 = vmatmul.mubr.msk.f32.vlgmr.msra.gmra.mxu0 %vm362_vm11, %v3264_v33  ;;  %v3280_v37 = vmul.f32 %v2968_v35, %v332_v21  ;;  %v2970_v44 = vpop.eup %2969 }
 0x1c3   :  { %2720 = vmatprep.mubr.msk.f32.mxu1 %vm362_vm11, %v3274_v36  ;;  %2728 = vmatprep.mubr.msk.f32.mxu0 %vm362_vm11, %v3274_v36  ;;  %v1307_v45 = vadd.f32 1.0, %v2970_v44  ;;  %v2972_v46 = vpop.eup %2971 }
 0x1c4   :  { %2732 = vmatpush3.msra.mxu1 %v583_v38  ;;  %2740 = vmatpush3.msra.mxu0 %v583_v38  ;;  %v1309_v47 = vadd.f32 1.0, %v2972_v46  ;;  %v2974_v48 = vpop.eup %2973 }
 0x1c5   :  { %2747 = vmatprep.subr.mxu1 %v3286_v39  ;;  %2755 = vmatprep.subr.mxu0 %v3286_v39  ;;  %2977 = vrcp.f32 %v1307_v45  ;;  %v1308_v49 = vadd.f32 1.0, %v2974_v48  ;;  %v2976_v50 = vpop.eup %2975 }
 0x1c6   :  { %2721 = vmatmul.mubr.msk.f32.gmra.mxu1 %vm362_vm11, %v3280_v37  ;;  %2729 = vmatmul.mubr.msk.f32.gmra.mxu0 %vm362_vm11, %v3280_v37  ;;  %2979 = vrcp.f32 %v1309_v47  ;;  %v1310_v51 = vadd.f32 1.0, %v2976_v50 }
 0x1c7   :  { %2981 = vrcp.f32 %v1308_v49 }
 0x1c8   :  { %2983 = vrcp.f32 %v1310_v51 }
 0x1d2   :  { %v2978_v59 = vpop.eup %2977 }
 0x1d3   :  { %v1319_v19 = vmul.f32 %v2978_v59, %v3218_v3  ;;  %v2980_v20 = vpop.eup %2979 }
 0x1d4   :  { %v1321_v18 = vmul.f32 %v2980_v20, %v3210_v63  ;;  %v2982_v24 = vpop.eup %2981  ;;  %v2533_v20 = vld [vmem:[#allocation2 + $0x48] ss:$0 sm:$0xff] }
 0x1d5   :  { %v1320_v26 = vmul.f32 %v2982_v24, %v3204_v60  ;;  %v2984_v27 = vpop.eup %2983 }
 0x1d6   :  { %v1322_v62 = vmul.f32 %v2984_v27, %v3202_v58 }
 0x282   :  { %v3294_v54 = vpop.f32.mrf.mxu1  ;;  %v2727_v55 = vpop.f32.mrf.mxu0 }
 0x283   :  { %v538_v57 = vadd.f32 %v2727_v55, %v2524_v52  ;;  %903 = vrot.lane.b32.xlu1 %v3294_v54, %s3097_s0 }
 0x284   :  { %v3298_v1 = vpop.f32.mrf.mxu1  ;;  %v532_v4 = vpop.f32.mrf.mxu0 }
 0x285   :  { %v556_v2 = vmin.f32 %v538_v57, 20.0  ;;  %v533_v5 = vadd.f32 %v2524_v52, %v532_v4  ;;  %901 = vrot.lane.b32.xlu0 %v3298_v1, %s3097_s0  ;;  %vm552_vm12 = vcmp.gt.f32.partialorder %v538_v57, 20.0  ;;  %v1187_v4 = vld [vmem:[#allocation2 + $0x90] sm:$0xff] }
 0x286   :  { %v3302_v6 = vpop.f32.mrf.mxu1  ;;  %v2730_v13 = vpop.f32.mrf.mxu0 }
 0x287   :  { %v561_v14 = vmul.f32 1.442695, %v556_v2  ;;  %v555_v15 = vmin.f32 %v533_v5, 20.0  ;;  %v548_v16 = vadd.f32 %v2730_v13, %v2524_v52  ;;  %vm551_vm13 = vcmp.gt.f32.partialorder %v533_v5, 20.0  ;;  %v1185_v2 = vld [vmem:[#allocation2 + $0x80] sm:$0xff]  ;;  %v1182_v13 = vld [vmem:[#allocation2 + $0x68] sm:$0xff] }
 0x288   :  { %v3305_v17 = vpop.f32.mrf.mxu1  ;;  %v542_v0 = vpop.f32.mrf.mxu0 }
 0x289   :  { %2985 = vpow2.f32 %v561_v14  ;;  %v559_v61 = vmul.f32 1.442695, %v555_v15  ;;  %v558_v21 = vmin.f32 %v548_v16, 20.0  ;;  %1327 = vrot.lane.b32.xlu0 %v1319_v19, %s3097_s0  ;;  %905 = vrot.lane.b32.xlu1 %v3305_v17, %s3097_s0  ;;  %v543_v22 = vadd.f32 %v2524_v52, %v542_v0  ;;  %v1181_v14 = vld [vmem:[#allocation2 + $0x60] sm:$0xff]  ;;  %v1180_v15 = vld [vmem:[#allocation2 + $0x58] sm:$0xff] }
 0x28a   :  { %vm554_vm14 = vcmp.gt.f32.partialorder %v548_v16, 20.0 }
 0x28b   :  { %2987 = vpow2.f32 %v559_v61  ;;  %v565_v23 = vmul.f32 1.442695, %v558_v21  ;;  %v557_v25 = vmin.f32 %v543_v22, 20.0  ;;  %vm553_vm15 = vcmp.gt.f32.partialorder %v543_v22, 20.0 }
 0x28d   :  { %2989 = vpow2.f32 %v565_v23  ;;  %1331 = vrot.lane.b32.xlu0 %v1321_v18, %s3097_s0  ;;  %907 = vrot.lane.b32.xlu1 %v3302_v6, %s3097_s0  ;;  %v563_v3 = vmul.f32 1.442695, %v557_v25 }
 0x28f   :  { %2991 = vpow2.f32 %v563_v3 }
 0x291   :  { %1329 = vrot.lane.b32.xlu1 %v1320_v26, %s3097_s0 }
 0x295   :  { %1333 = vrot.lane.b32.xlu1 %v1322_v62, %s3097_s0 }
 0x296   :  { %v2986_v63 = vpop.eup %2985 }
 0x297   :  { %v568_v28 = vadd.f32 1.0, %v2986_v63 }
 0x298   :  { %v2988_v29 = vpop.eup %2987 }
 0x299   :  { %2993 = vlog2.f32 %v568_v28  ;;  %v567_v30 = vadd.f32 1.0, %v2988_v29 }
 0x29a   :  { %v2990_v31 = vpop.eup %2989 }
 0x29b   :  { %2995 = vlog2.f32 %v567_v30  ;;  %v570_v34 = vadd.f32 1.0, %v2990_v31 }
 0x29c   :  { %v2992_v35 = vpop.eup %2991 }
 0x29d   :  { %2997 = vlog2.f32 %v570_v34  ;;  %v569_v38 = vadd.f32 1.0, %v2992_v35 }
 0x29f   :  { %2999 = vlog2.f32 %v569_v38 }
 0x2a6   :  { %v2994_v60 = vpop.eup %2993 }
 0x2a7   :  { %v574_v40 = vmul.f32 0.6931472, %v2994_v60 }
 0x2a8   :  { %v2996_v41 = vpop.eup %2995 }
 0x2a9   :  { %v572_v42 = vmul.f32 0.6931472, %v2996_v41  ;;  %v580_v43 = vsel %vm552_vm12, %v538_v57, %v574_v40 }
 0x2aa   :  { %v2998_v58 = vpop.eup %2997  ;;  %v699_v48 = vmul.f32 %v580_v43, %v3264_v33 }
 0x2ab   :  { %v579_v44 = vsel %vm551_vm13, %v533_v5, %v572_v42  ;;  %v578_v45 = vmul.f32 0.6931472, %v2998_v58  ;;  %v1184_v5 = vld [vmem:[#allocation2 + $0x78] sm:$0xff] }
 0x2ac   :  { %2733 = vmatprep.mubr.msk.f32.mxu1 %vm362_vm11, %v579_v44  ;;  %v698_v46 = vmul.f32 %v579_v44, %v3262_v32  ;;  %v3000_v47 = vpop.eup %2999 }
 0x2ad   :  { %2734 = vmatmul.mubr.msk.f32.vlgmr.msra.gmra.mxu1 %vm362_vm11, %v580_v43  ;;  %v576_v49 = vmul.f32 0.6931472, %v3000_v47  ;;  %v582_v50 = vsel %vm554_vm14, %v548_v16, %v578_v45 }
 0x2ae   :  { %2741 = vmatprep.mubr.msk.f32.mxu0 %vm362_vm11, %v698_v46  ;;  %2748 = vmatpush3.msra.mxu1 %v3286_v39  ;;  %v701_v55 = vmul.f32 %v582_v50, %v3280_v37 }
 0x2af   :  { %2742 = vmatmul.mubr.msk.f32.vlgmr.msra.gmra.mxu0 %vm362_vm11, %v699_v48  ;;  %v581_v51 = vsel %vm553_vm15, %v543_v22, %v576_v49  ;;  %2763 = vmatprep.subr.mxu1 %v1187_v4 }
 0x2b0   :  { %2756 = vmatpush3.msra.mxu0 %v3286_v39  ;;  %2736 = vmatprep.mubr.msk.f32.mxu1 %vm362_vm11, %v581_v51  ;;  %v700_v52 = vmul.f32 %v581_v51, %v3274_v36 }
 0x2b1   :  { %2737 = vmatmul.mubr.msk.f32.gmra.mxu1 %vm362_vm11, %v582_v50 }
 0x2b2   :  { %2744 = vmatprep.mubr.msk.f32.mxu0 %vm362_vm11, %v700_v52  ;;  %2749 = vmatprep.mubr.msk.f32.mxu1 %vm362_vm11, %v3298_v1 }
 0x2b3   :  { %2745 = vmatmul.mubr.msk.f32.gmra.mxu0 %vm362_vm11, %v701_v55 }
 0x2b5   :  { %2750 = vmatmul.mubr.msk.f32.vlgmr.msra.gmra.mxu1 %vm362_vm11, %v3294_v54  ;;  %v1186_v54 = vld [vmem:[#allocation2 + $0x88] sm:$0xff] }
 0x2b6   :  { %2752 = vmatprep.mubr.msk.f32.mxu1 %vm362_vm11, %v3305_v17  ;;  %2764 = vmatpush3.msra.mxu1 %v1187_v4 }
 0x2b7   :  { %2765 = vmatprep.subr.mxu1 %v1186_v54 }
 0x2b8   :  { %2766 = vmatpush3.msra.mxu1 %v1186_v54 }
 0x2b9   :  { %2753 = vmatmul.mubr.msk.f32.gmra.mxu1 %vm362_vm11, %v3302_v6  ;;  %2767 = vmatprep.subr.mxu1 %v1185_v2  ;;  %v1183_v6 = vld [vmem:[#allocation2 + $0x70] sm:$0xff] }
 0x2ba   :  { %2768 = vmatpush3.msra.mxu1 %v1185_v2 }
 0x2bb   :  { %2769 = vmatprep.subr.mxu1 %v1184_v5 }
 0x2bc   :  { %2770 = vmatpush3.msra.mxu1 %v1184_v5 }
 0x2bd   :  { %2771 = vmatprep.subr.mxu1 %v1183_v6 }
 0x2be   :  { %2772 = vmatpush3.msra.mxu1 %v1183_v6 }
 0x2bf   :  { %2773 = vmatprep.subr.mxu1 %v1182_v13 }
 0x2c0   :  { %2774 = vmatpush3.msra.mxu1 %v1182_v13 }
 0x2c1   :  { %2775 = vmatprep.subr.mxu1 %v1181_v14 }
 0x2c2   :  { %2776 = vmatpush3.msra.mxu1 %v1181_v14 }
 0x2c3   :  { %2777 = vmatprep.subr.mxu1 %v1180_v15 }
 0x2c4   :  { %2778 = vmatpush3.msra.mxu1 %v1180_v15 }
 0x2f5   :  { %v904_v39 = vpop.permute.xlu1 %903 }
 0x2f7   :  { %v902_v57 = vpop.permute.xlu0 %901 }
 0x2f8   :  { %2757 = vmatprep.mubr.msk.f32.mxu0 %vm362_vm11, %v902_v57 }
 0x2f9   :  { %2758 = vmatmul.mubr.msk.f32.vlgmr.msra.gmra.mxu0 %vm362_vm11, %v904_v39 }
 0x2fb   :  { %v906_v59 = vpop.permute.xlu1 %905 }
 0x2fc   :  { %2760 = vmatprep.mubr.msk.f32.mxu0 %vm362_vm11, %v906_v59 }
 0x2ff   :  { %v908_v1 = vpop.permute.xlu1 %907 }
 0x300   :  { %2761 = vmatmul.mubr.msk.f32.gmra.mxu0 %vm362_vm11, %v908_v1 }
 0x36d   :  { %v2735_v16 = vpop.f32.mrf.mxu1 }
 0x36e   :  { %v687_v25 = vmul.f32 %v2735_v16, %v2533_v20 }
 0x36f   :  { %v662_v19 = vpop.f32.mrf.mxu1  ;;  %v2743_v23 = vpop.f32.mrf.mxu0 }
 0x370   :  { %v686_v0 = vmul.f32 %v2533_v20, %v662_v19  ;;  %v692_v63 = vmul.f32 1.442695, %v687_v25 }
 0x371   :  { %v2738_v17 = vpop.f32.mrf.mxu1  ;;  %v780_v3 = vpop.f32.mrf.mxu0 }
 0x372   :  { %v690_v21 = vmul.f32 1.442695, %v686_v0  ;;  %v689_v60 = vmul.f32 %v2738_v17, %v2533_v20 }
 0x373   :  { %v672_v61 = vpop.f32.mrf.mxu1  ;;  %v2746_v28 = vpop.f32.mrf.mxu0 }
 0x374   :  { %v688_v18 = vmul.f32 %v2533_v20, %v672_v61  ;;  %3001 = vpow2.f32 %v690_v21  ;;  %v696_v43 = vmul.f32 1.442695, %v689_v60 }
 0x375   :  { %v2751_v22 = vpop.f32.mrf.mxu1  ;;  %v790_v31 = vpop.f32.mrf.mxu0 }
 0x376   :  { %v694_v26 = vmul.f32 1.442695, %v688_v18  ;;  %v898_v40 = vmul.f32 %v2751_v22, %v2743_v23 }
 0x377   :  { %v878_v24 = vpop.f32.mrf.mxu1 }
 0x378   :  { %v897_v27 = vmul.f32 %v878_v24, %v780_v3  ;;  %3003 = vpow2.f32 %v694_v26  ;;  %v1007_v44 = vrot.slane %v898_v40, 7 }
 0x379   :  { %v2754_v62 = vpop.f32.mrf.mxu1  ;;  %3005 = vpow2.f32 %v692_v63 }
 0x37a   :  { %v1006_v29 = vrot.slane %v897_v27, 7  ;;  %3007 = vpow2.f32 %v696_v43  ;;  %v900_v14 = vmul.f32 %v2754_v62, %v2746_v28 }
 0x37b   :  { %v888_v30 = vpop.f32.mrf.mxu1 }
 0x37c   :  { %v899_v34 = vmul.f32 %v888_v30, %v790_v31  ;;  %v1017_v35 = vsel %vm225_vm2, 0.0, %v1006_v29  ;;  %v1008_v55 = vsel %vm225_vm2, %v1006_v29, %v1007_v44  ;;  %v1011_v22 = vrot.slane %v900_v14, 7 }
 0x37d   :  { %v1018_v41 = vsel %vm238_vm4, %v1017_v35, 0.0 }
 0x37e   :  { %v1009_v42 = vrot.slane %v899_v34, 7 }
 0x380   :  { %v1010_v46 = vsel %vm225_vm2, %v1007_v44, %v1009_v42  ;;  %v1012_v25 = vsel %vm225_vm2, %v1009_v42, %v1011_v22 }
 0x381   :  { %v3002_v38 = vpop.eup %3001  ;;  %v1020_v51 = vsel %vm240_vm7, %v1010_v46, 0.0 }
 0x382   :  { %v1022_v58 = vmul.f32 %v3002_v38, %v1018_v41  ;;  %v1034_v45 = vrot.slane %v3002_v38, 7 }
 0x384   :  { %v1026_v48 = vadd.f32 %v1022_v58, %v897_v27  ;;  %v1045_v49 = vsel %vm225_vm2, 1.0, %v1034_v45 }
 0x385   :  { %v3004_v47 = vpop.eup %3003  ;;  %v1046_v39 = vsel %vm238_vm4, %v1045_v49, 1.0  ;;  %vm1124_vm4 = vcmp.ge.s32.totalorder %v3200_v56, 4 }
 0x386   :  { %v3006_v50 = vpop.eup %3005  ;;  %v1024_v52 = vmul.f32 %v3004_v47, %v1020_v51  ;;  %v1058_v57 = vrot.slane %v1026_v48, 6  ;;  %v1037_v59 = vrot.slane %v3004_v47, 7  ;;  %v1050_v54 = vmul.f32 %v3002_v38, %v1046_v39 }
 0x387   :  { %v1023_v1 = vmul.f32 %v3006_v50, %v1008_v55  ;;  %v1035_v4 = vrot.slane %v3006_v50, 7  ;;  %v3008_v61 = vpop.eup %3007 }
 0x388   :  { %v1028_v2 = vadd.f32 %v1024_v52, %v899_v34  ;;  %v1069_v5 = vsel %vm258_vm3, 0.0, %v1058_v57  ;;  %v1086_v16 = vrot.slane %v1050_v54, 6  ;;  %v1025_v26 = vmul.f32 %v3008_v61, %v1012_v25 }
 0x389   :  { %v1038_v6 = vsel %vm225_vm2, %v1035_v4, %v1037_v59  ;;  %v1027_v13 = vadd.f32 %v1023_v1, %v898_v40  ;;  %v1070_v15 = vsel %vm271_vm5, %v1069_v5, 0.0  ;;  %v1036_v0 = vsel %vm225_vm2, %v1034_v45, %v1035_v4 }
 0x38a   :  { %v1048_v19 = vsel %vm240_vm7, %v1038_v6, 1.0  ;;  %v1061_v20 = vrot.slane %v1028_v2, 6  ;;  %v1074_v21 = vmul.f32 %v1070_v15, %v1050_v54  ;;  %v1097_v24 = vsel %vm258_vm3, 1.0, %v1086_v16 }
 0x38b   :  { %v1059_v17 = vrot.slane %v1027_v13, 6  ;;  %v1052_v23 = vmul.f32 %v3004_v47, %v1048_v19  ;;  %v1051_v3 = vmul.f32 %v3006_v50, %v1036_v0  ;;  %v1039_v27 = vrot.slane %v3008_v61, 7 }
 0x38c   :  { %v1078_v62 = vadd.f32 %v1074_v21, %v1026_v48  ;;  %v1098_v29 = vsel %vm271_vm5, %v1097_v24, 1.0  ;;  %v1029_v60 = vadd.f32 %v1025_v26, %v900_v14  ;;  %vm1463_vm5 = vcmask 130048  }
 0x38d   :  { %v1062_v18 = vsel %vm258_vm3, %v1059_v17, %v1061_v20  ;;  %v1089_v28 = vrot.slane %v1052_v23, 6  ;;  %v1060_v30 = vsel %vm258_vm3, %v1058_v57, %v1059_v17  ;;  %v1087_v31 = vrot.slane %v1051_v3, 6 }
 0x38e   :  { %v1072_v63 = vsel %vm273_vm9, %v1062_v18, 0.0  ;;  %v1040_v34 = vsel %vm225_vm2, %v1037_v59, %v1039_v27  ;;  %v1102_v38 = vmul.f32 %v1098_v29, %v1050_v54  ;;  %v1110_v40 = vrot.slane %v1078_v62, 4 }
 0x38f   :  { %v1076_v35 = vmul.f32 %v1072_v63, %v1052_v23  ;;  %v1090_v41 = vsel %vm258_vm3, %v1087_v31, %v1089_v28  ;;  %v1075_v42 = vmul.f32 %v1060_v30, %v1051_v3  ;;  %v1053_v58 = vmul.f32 %v3008_v61, %v1040_v34 }
 0x390   :  { %v1088_v43 = vsel %vm258_vm3, %v1086_v16, %v1087_v31  ;;  %v1142_v45 = vrot.slane %v1102_v38, 4  ;;  %v1063_v46 = vrot.slane %v1029_v60, 6  ;;  %v1100_v47 = vsel %vm273_vm9, %v1090_v41, 1.0 }
 0x391   :  { %v1080_v44 = vadd.f32 %v1076_v35, %v1028_v2  ;;  %v1121_v48 = vsel %vm123_vm1, 0.0, %v1110_v40  ;;  %vm1122_vm2 = vcmp.ge.s32.totalorder %v3196_v53, 4  ;;  %v1079_v49 = vadd.f32 %v1075_v42, %v1027_v13 }
 0x392   :  { %v1103_v50 = vmul.f32 %v1088_v43, %v1051_v3  ;;  %v1064_v51 = vsel %vm258_vm3, %v1061_v20, %v1063_v46  ;;  %v1091_v52 = vrot.slane %v1053_v58, 6  ;;  %v1104_v55 = vmul.f32 %v1100_v47, %v1052_v23 }
 0x393   :  { %v1113_v39 = vrot.slane %v1080_v44, 4  ;;  %v1126_v57 = vsel %vm1122_vm2, %v1121_v48, 0.0  ;;  %v1153_v59 = vsel %vm123_vm1, 1.0, %v1142_v45  ;;  %v1077_v1 = vmul.f32 %v1064_v51, %v1053_v58 }
 0x394   :  { %v1111_v4 = vrot.slane %v1079_v49, 4  ;;  %v1143_v54 = vrot.slane %v1103_v50, 4  ;;  %v1092_v2 = vsel %vm258_vm3, %v1089_v28, %v1091_v52  ;;  %v1130_v5 = vmul.f32 %v1126_v57, %v1102_v38 }
 0x395   :  { %v1154_v6 = vsel %vm1122_vm2, %v1153_v59, 1.0  ;;  %v1145_v14 = vrot.slane %v1104_v55, 4  ;;  %v1081_v13 = vadd.f32 %v1077_v1, %v1029_v60  ;;  %v1105_v15 = vmul.f32 %v1092_v2, %v1053_v58  ;;  %v1328_v1 = vpop.permute.xlu0 %1327 }
 0x396   :  { %v1114_v53 = vsel %vm123_vm1, %v1111_v4, %v1113_v39  ;;  %v1112_v16 = vsel %vm123_vm1, %v1110_v40, %v1111_v4  ;;  %v1144_v19 = vsel %vm123_vm1, %v1142_v45, %v1143_v54  ;;  %v1158_v20 = vmul.f32 %v1154_v6, %v1102_v38  ;;  %v1330_v4 = vpop.permute.xlu1 %1329 }
 0x397   :  { %v1134_v17 = vadd.f32 %v1130_v5, %v1078_v62  ;;  %v1128_v0 = vsel %vm1124_vm4, %v1114_v53, 0.0  ;;  %v1146_v61 = vsel %vm123_vm1, %v1143_v54, %v1145_v14  ;;  %v1131_v21 = vmul.f32 %v1112_v16, %v1103_v50 }
 0x398   :  { %v1159_v22 = vmul.f32 %v1144_v19, %v1103_v50  ;;  %v1115_v23 = vrot.slane %v1081_v13, 4  ;;  %v1147_v18 = vrot.slane %v1105_v15, 4  ;;  %v1168_v24 = vmul.f32 0.0, %v1158_v20  ;;  %v2546_v50 = vld [vmem:[#allocation2 + $0x50] ss:$0 sm:$0xff] }
 0x399   :  { %v1132_v25 = vmul.f32 %v1128_v0, %v1104_v55  ;;  %v1156_v3 = vsel %vm1124_vm4, %v1146_v61, 1.0  ;;  %v1135_v27 = vadd.f32 %v1131_v21, %v1079_v49  ;;  %vm1197_vm3 = vcmask 523264   ;;  %v1343_v49 = vld [vmem:[#allocation2 + $0x98] sm:$0xff] }
 0x39a   :  { %v1169_v26 = vmul.f32 %v1159_v22, %v1134_v17  ;;  %v1116_v63 = vsel %vm123_vm1, %v1113_v39, %v1115_v23  ;;  %v1148_v28 = vsel %vm123_vm1, %v1145_v14, %v1147_v18  ;;  %v1160_v29 = vmul.f32 %v1156_v3, %v1104_v55  ;;  %2785 = vmatprep.subr.mxu0 %v1343_v49  ;;  %v1461_v3 = vld [vmem:[#allocation2 + $0xb0] sm:$0xff] }
 0x39b   :  { %v1172_v30 = vadd.f32 %v1168_v24, %v1134_v17  ;;  %v1136_v62 = vadd.f32 %v1132_v25, %v1080_v44  ;;  %v1133_v38 = vmul.f32 %v1116_v63, %v1105_v15  ;;  %v1161_v60 = vmul.f32 %v1148_v28, %v1105_v15  ;;  %2786 = vmatpush3.msra.mxu0 %v1343_v49  ;;  %v1334_v15 = vpop.permute.xlu1 %1333  ;;  %v3417_v63 = vld [vmem:[#allocation2 + $0xe8] sm:$0xff]  ;;  %v3419_v28 = vld [vmem:[#allocation2 + $0xe0] sm:$0xff] }
 0x39c   :  { %v1173_v31 = vadd.f32 %v1169_v26, %v1135_v27  ;;  %v1170_v41 = vmul.f32 0.0, %v1160_v29  ;;  %v1194_v51 = vmul.f32 %v2546_v50, %v3264_v33  ;;  %v1193_v55 = vmul.f32 %v2546_v50, %v3262_v32  ;;  %v1332_v32 = vpop.permute.xlu0 %1331  ;;  %v3411_v26 = vld [vmem:[#allocation2 + $0xf0] sm:$0xff]  ;;  %v3413_v27 = vld [vmem:[#allocation2 + $0xf8] sm:$0xff] }
 0x39d   :  { %v1171_v42 = vmul.f32 %v1161_v60, %v1136_v62  ;;  %v1137_v43 = vadd.f32 %v1133_v38, %v1081_v13  ;;  %v1196_v5 = vmul.f32 %v2546_v50, %v3280_v37  ;;  %v1195_v14 = vmul.f32 %v2546_v50, %v3274_v36  ;;  %v1459_v37 = vld [vmem:[#allocation2 + $0xa0] sm:$0xff]  ;;  %v1683_v60 = vld [vmem:[#allocation2 + $0x108] sm:$0xff] }
 0x39e   :  { %v1174_v45 = vadd.f32 %v1170_v41, %v1136_v62  ;;  %v3100_v29 = vmov 5   ;;  %v3102_v62 = vmov 7   ;;  %v1685_v41 = vld [vmem:[#allocation2 + $0x118] sm:$0xff]  ;;  %v1785_v49 = vstv %s1784_s4 }
 0x39f   :  { %v1175_v46 = vadd.f32 %v1171_v42, %v1137_v43  ;;  %v1561_v42 = vld [vmem:[#allocation2 + $0xc0] sm:$0xff]  ;;  %v1563_v43 = vld [vmem:[#allocation2 + $0xd0] sm:$0xff]  ;;  %vm3108_vm7 = vmmov 0  }
 0x3b9   :  { %v2759_v56 = vpop.f32.mrf.mxu0 }
 0x3ba   :  { %v1177_v40 = vmul.f32 %v2759_v56, %v1173_v31  ;;  %v3099_v56 = vmov 4  }
 0x3bb   :  { %v983_v34 = vpop.f32.mrf.mxu0  ;;  %2926 = vset.pattern.permute.xlu1 %v3099_v56  ;;  %2925 = vset.pattern.permute.xlu0 %v3099_v56 }
 0x3bc   :  { %v1176_v35 = vmul.f32 %v1172_v30, %v983_v34  ;;  %v3101_v30 = vmov 6  }
 0x3be   :  { %2779 = vmatprep.mubr.msk.f32.mxu1 %vm1197_vm3, %v1176_v35 }
 0x3bf   :  { %2780 = vmatmul.mubr.msk.f32.vlgmr.msra.gmra.mxu1 %vm1197_vm3, %v1177_v40  ;;  %v1684_v40 = vld [vmem:[#allocation2 + $0x110] sm:$0xff] }
 0x3c0   :  { %v2762_v58 = vpop.f32.mrf.mxu0 }
 0x3c1   :  { %v1179_v44 = vmul.f32 %v2762_v58, %v1175_v46  ;;  %v1562_v58 = vld [vmem:[#allocation2 + $0xc8] sm:$0xff]  ;;  %v3442_v46 = vld [vmem:[#allocation2 + $0x120] sm:$0xff] }
 0x3c2   :  { %v993_v47 = vpop.f32.mrf.mxu0 }
 0x3c3   :  { %v1178_v48 = vmul.f32 %v1174_v45, %v993_v47  ;;  %v1564_v45 = vld [vmem:[#allocation2 + $0xd8] sm:$0xff]  ;;  %v3103_v47 = vmov 0  }
 0x3c5   :  { %2782 = vmatprep.mubr.msk.f32.mxu1 %vm1197_vm3, %v1178_v48 }
 0x3c6   :  { %2783 = vmatmul.mubr.msk.f32.gmra.mxu1 %vm1197_vm3, %v1179_v44 }
 0x3c7   :  { %2807 = vmatprep.mubr.msk.f32.mxu1 %vm1463_vm5, %v1561_v42 }
 0x47f   :  { %v2781_v52 = vpop.f32.mrf.mxu1 }
 0x480   :  { %v1282_v39 = vadd.f32 %v2781_v52, %v1194_v51 }
 0x481   :  { %v1276_v57 = vpop.f32.mrf.mxu1 }
 0x482   :  { %v1277_v59 = vadd.f32 %v1276_v57, %v1193_v55  ;;  %v1340_v2 = vmul.f32 %v1330_v4, %v1282_v39 }
 0x484   :  { %v1339_v54 = vmul.f32 %v1328_v1, %v1277_v59 }
 0x486   :  { %v2784_v6 = vpop.f32.mrf.mxu1  ;;  %2787 = vmatprep.mubr.msk.f32.mxu0 %vm362_vm11, %v1339_v54 }
 0x487   :  { %2788 = vmatmul.mubr.msk.f32.vlgmr.msra.gmra.mxu0 %vm362_vm11, %v1340_v2  ;;  %v1292_v33 = vadd.f32 %v2784_v6, %v1196_v5 }
 0x488   :  { %v1286_v53 = vpop.f32.mrf.mxu1 }
 0x489   :  { %v1287_v13 = vadd.f32 %v1286_v53, %v1195_v14  ;;  %v1342_v19 = vmul.f32 %v1334_v15, %v1292_v33  ;;  %v3464_v15 = vld [vmem:[#allocation2 + $0x128] sm:$0xff] }
 0x48b   :  { %v1341_v16 = vmul.f32 %v1332_v32, %v1287_v13 }
 0x48d   :  { %2790 = vmatprep.mubr.msk.f32.mxu0 %vm362_vm11, %v1341_v16  ;;  %v3466_v16 = vld [vmem:[#allocation2 + $0x130] sm:$0xff] }
 0x48e   :  { %2791 = vmatmul.mubr.msk.f32.gmra.mxu0 %vm362_vm11, %v1342_v19  ;;  %v3472_v19 = vld [vmem:[#allocation2 + $0x138] sm:$0xff] }
 0x48f   :  { %2797 = vmatprep.mubr.msk.f32.mxu0 %vm1463_vm5, %v1459_v37 }
 0x547   :  { %v2789_v20 = vpop.f32.mrf.mxu0 }
 0x548   :  { %v1428_v22 = vadd.f32 %v2789_v20, %v3166_v12  ;;  %v1682_v12 = vld [vmem:[#allocation2 + $0x100] sm:$0xff] }
 0x549   :  { %v1422_v17 = vpop.f32.mrf.mxu0 }
 0x54a   :  { %v1423_v18 = vadd.f32 %v1422_v17, %v3160_v10  ;;  %v1462_v10 = vld [vmem:[#allocation2 + $0xb8] sm:$0xff] }
 0x54e   :  { %v2792_v0 = vpop.f32.mrf.mxu0 }
 0x54f   :  { %v1438_v36 = vadd.f32 %v2792_v0, %v3163_v11 }
 0x550   :  { %v1432_v61 = vpop.f32.mrf.mxu0 }
 0x551   :  { %v1433_v21 = vadd.f32 %v1432_v61, %v3157_v9  ;;  %1445 = vrot.lane.b32.xlu0 %v1438_v36, %s3098_s30  ;;  %v1460_v9 = vld [vmem:[#allocation2 + $0xa8] sm:$0xff]  ;;  %v1815_v61 = vstv %s2571_s5 }
 0x553   :  { %1443 = vrot.lane.b32.xlu1 %v1433_v21, %s3098_s30 }
 0x555   :  { %1803 = vperm.xlu0 %2925, %v3413_v27  }
 0x557   :  { %1799 = vperm.xlu1 %2926, %v3411_v26  }
 0x559   :  { %1791 = vperm.xlu0 %2925, %v3419_v28  }
 0x55b   :  { %1795 = vperm.xlu1 %2926, %v3417_v63  }
 0x55d   :  { %2928 = vset.pattern.permute.xlu0 %v3100_v29 }
 0x55e   :  { %1829 = vperm.xlu0 %2928, %v3411_v26  }
 0x55f   :  { %2927 = vset.pattern.permute.xlu1 %v3100_v29 }
 0x560   :  { %1833 = vperm.xlu1 %2927, %v3413_v27  }
 0x562   :  { %2929 = vset.pattern.permute.xlu0 %v3101_v30 }
 0x563   :  { %1964 = vperm.xlu0 %2929, %v3413_v27  }
 0x564   :  { %1825 = vperm.xlu1 %2927, %v3417_v63  }
 0x567   :  { %1952 = vperm.xlu0 %2929, %v3419_v28  }
 0x568   :  { %1821 = vperm.xlu1 %2927, %v3419_v28  }
 0x56b   :  { %2932 = vset.pattern.permute.xlu0 %v3102_v62 }
 0x56c   :  { %2930 = vset.pattern.permute.xlu1 %v3101_v30  ;;  %2079 = vperm.xlu0 %2932, %v3411_v26  }
 0x56d   :  { %1960 = vperm.xlu1 %2930, %v3411_v26  }
 0x570   :  { %2933 = vset.pattern.permute.xlu0 %v3103_v47 }
 0x571   :  { %1956 = vperm.xlu1 %2930, %v3417_v63   ;;  %1582 = vperm.xlu0 %2933, %v3413_v27  }
 0x575   :  { %2931 = vset.pattern.permute.xlu1 %v3102_v62  ;;  %1567 = vperm.xlu0 %2933, %v3419_v28  }
 0x576   :  { %2083 = vperm.xlu1 %2931, %v3413_v27  }
 0x57a   :  { %2075 = vperm.xlu1 %2931, %v3417_v63  }
 0x57e   :  { %2071 = vperm.xlu1 %2931, %v3419_v28  }
 0x582   :  { %2934 = vset.pattern.permute.xlu1 %v3103_v47 }
 0x583   :  { %1577 = vperm.xlu1 %2934, %v3411_v26  }
 0x587   :  { %1572 = vperm.xlu1 %2934, %v3417_v63  }
 0x5c3   :  { %v1446_v23 = vpop.permute.xlu0 %1445 }
 0x5c4   :  { %v1450_v24 = vsel %vm71_vm0, %v1428_v22, %v1446_v23 }
 0x5c5   :  { %2793 = vmatprep.subr.mxu0 %v1450_v24  ;;  %2803 = vmatprep.subr.mxu1 %v1450_v24  ;;  %v1444_v25 = vpop.permute.xlu1 %1443 }
 0x5c6   :  { %v1449_v11 = vsel %vm71_vm0, %v1423_v18, %v1444_v25  ;;  %2794 = vmatpush3.msra.mxu0 %v1450_v24  ;;  %2804 = vmatpush3.msra.mxu1 %v1450_v24 }
 0x5c7   :  { %2795 = vmatprep.subr.mxu0 %v1449_v11  ;;  %2805 = vmatprep.subr.mxu1 %v1449_v11 }
 0x5c8   :  { %2796 = vmatpush3.msra.mxu0 %v1449_v11  ;;  %2806 = vmatpush3.msra.mxu1 %v1449_v11 }
 0x5c9   :  { %2798 = vmatmul.mubr.msk.f32.vlgmr.msra.gmra.mxu0 %vm1463_vm5, %v1460_v9  ;;  %2808 = vmatmul.mubr.msk.f32.vlgmr.msra.gmra.mxu1 %vm1463_vm5, %v1562_v58 }
 0x5ca   :  { %2800 = vmatprep.mubr.msk.f32.mxu0 %vm1463_vm5, %v1461_v3  ;;  %2810 = vmatprep.mubr.msk.f32.mxu1 %vm1463_vm5, %v1563_v43 }
 0x5cd   :  { %2801 = vmatmul.mubr.msk.f32.gmra.mxu0 %vm1463_vm5, %v1462_v10  ;;  %2811 = vmatmul.mubr.msk.f32.gmra.mxu1 %vm1463_vm5, %v1564_v45  ;;  %v1946_v45 = vstv %s2576_s6 }
 0x5ce   :  { %2821 = vmatprep.mubr.msk.f32.mxu0 %vm1686_vm6, %v1682_v12  ;;  %2835 = vmatprep.mubr.msk.f32.mxu1 %vm1686_vm6, %v3442_v46 }
 0x5d0   :  { %v1804_v51 = vpop.permute.xlu0 %1803 }
 0x5d2   :  { %v1800_v44 = vpop.permute.xlu1 %1799 }
 0x5d4   :  { %v1792_v6 = vpop.permute.xlu0 %1791 }
 0x5d6   :  { %v1796_v54 = vpop.permute.xlu1 %1795 }
 0x5d9   :  { %v1830_v3 = vpop.permute.xlu0 %1829 }
 0x5db   :  { %v1834_v17 = vpop.permute.xlu1 %1833 }
 0x5de   :  { %v1965_v43 = vpop.permute.xlu0 %1964 }
 0x5df   :  { %v1826_v22 = vpop.permute.xlu1 %1825 }
 0x5e3   :  { %v1822_v30 = vpop.permute.xlu1 %1821 }
 0x5e8   :  { %v1961_v58 = vpop.permute.xlu1 %1960 }
 0x689   :  { %v2799_v31 = vpop.f32.mrf.mxu0  ;;  %v3478_v20 = vpop.f32.mrf.mxu1 }
 0x68b   :  { %v1542_v34 = vpop.f32.mrf.mxu0  ;;  %v3480_v37 = vpop.f32.mrf.mxu1 }
 0x68d   :  { %v2802_v35 = vpop.f32.mrf.mxu0  ;;  %v3482_v0 = vpop.f32.mrf.mxu1 }
 0x68e   :  { %2813 = vmatprep.subr.mxu0 %v2802_v35 }
 0x68f   :  { %v1552_v38 = vpop.f32.mrf.mxu0  ;;  %2814 = vmatpush3.msra.mxu0 %v2802_v35  ;;  %v3484_v36 = vpop.f32.mrf.mxu1 }
 0x690   :  { %2815 = vmatprep.subr.mxu0 %v1552_v38 }
 0x691   :  { %2816 = vmatpush3.msra.mxu0 %v1552_v38 }
 0x692   :  { %2817 = vmatprep.subr.mxu0 %v2799_v31 }
 0x693   :  { %2818 = vmatpush3.msra.mxu0 %v2799_v31 }
 0x694   :  { %2819 = vmatprep.subr.mxu0 %v1542_v34 }
 0x695   :  { %2820 = vmatpush3.msra.mxu0 %v1542_v34 }
 0x696   :  { %2822 = vmatmul.mubr.msk.f32.vlgmr.msra.gmra.mxu0 %vm1686_vm6, %v1683_v60 }
 0x697   :  { %2824 = vmatprep.mubr.msk.f32.mxu0 %vm1686_vm6, %v1684_v40 }
 0x69a   :  { %2825 = vmatmul.mubr.msk.f32.gmra.mxu0 %vm1686_vm6, %v1685_v41 }
 0x69b   :  { %2849 = vmatprep.mubr.msk.f32.mxu0 %vm1686_vm6, %v3442_v46 }
 0x756   :  { %v3452_v48 = vpop.f32.mrf.mxu0 }
 0x757   :  { %v1787_v55 = vmul.f32 %v3452_v48, %v1785_v49  ;;  %v1817_v18 = vmul.f32 %v3452_v48, %v1815_v61 }
 0x758   :  { %v3454_v50 = vpop.f32.mrf.mxu0 }
 0x759   :  { %v1786_v59 = vmul.f32 %v1785_v49, %v3454_v50  ;;  %v1807_v2 = vadd.f32 %v1796_v54, %v1787_v55  ;;  %v1816_v11 = vmul.f32 %v1815_v61, %v3454_v50  ;;  %v1837_v12 = vadd.f32 %v1826_v22, %v1817_v18 }
 0x75a   :  { %v3456_v52 = vpop.f32.mrf.mxu0  ;;  %v3104_v22 = vmov 1   ;;  %v3106_v18 = vmov 2  }
 0x75b   :  { %v1789_v39 = vmul.f32 %v3456_v52, %v1785_v49  ;;  %v1806_v14 = vadd.f32 %v1792_v6, %v1786_v59  ;;  %v1819_v21 = vmul.f32 %v3456_v52, %v1815_v61  ;;  %v1836_v34 = vadd.f32 %v1822_v30, %v1816_v11  ;;  %2935 = vset.pattern.permute.xlu1 %v3104_v22 }
 0x75c   :  { %v3460_v57 = vpop.f32.mrf.mxu0  ;;  %v1950_v47 = vmul.f32 %v3456_v52, %v1946_v45  ;;  %v1947_v59 = vmul.f32 %v1946_v45, %v3454_v50  ;;  %2936 = vset.pattern.permute.xlu0 %v3104_v22  ;;  %2200 = vperm.xlu1 %2935, %v3413_v27  }
 0x75d   :  { %v1809_v1 = vadd.f32 %v1804_v51, %v1789_v39  ;;  %v1788_v4 = vmul.f32 %v1785_v49, %v3460_v57  ;;  %v1818_v24 = vmul.f32 %v1815_v61, %v3460_v57  ;;  %v1839_v9 = vadd.f32 %v1834_v17, %v1819_v21  ;;  %v1957_v39 = vpop.permute.xlu1 %1956  ;;  %2196 = vperm.xlu0 %2936, %v3411_v26  }
 0x75e   :  { %v1948_v49 = vmul.f32 %v3452_v48, %v1946_v45  ;;  %v1949_v51 = vmul.f32 %v1946_v45, %v3460_v57 }
 0x75f   :  { %3009 = vtanh.f32 %v1809_v1  ;;  %v1808_v5 = vadd.f32 %v1800_v44, %v1788_v4  ;;  %v1838_v29 = vadd.f32 %v1830_v3, %v1818_v24  ;;  %v1970_v1 = vadd.f32 %v1965_v43, %v1950_v47  ;;  %v1953_v4 = vpop.permute.xlu0 %1952 }
 0x760   :  { %v2065_v24 = vstv %s2581_s7 }
 0x761   :  { %3011 = vtanh.f32 %v1808_v5  ;;  %v1969_v5 = vadd.f32 %v1961_v58, %v1949_v51  ;;  %2939 = vset.pattern.permute.xlu0 %v3106_v18  ;;  %v2066_v11 = vmul.f32 %v2065_v24, %v3454_v50 }
 0x762   :  { %3013 = vtanh.f32 %v1807_v2  ;;  %v1968_v2 = vadd.f32 %v1957_v39, %v1948_v49  ;;  %2302 = vperm.xlu0 %2939, %v3413_v27  }
 0x763   :  { %3015 = vtanh.f32 %v1806_v14  ;;  %v1967_v14 = vadd.f32 %v1953_v4, %v1947_v59 }
 0x766   :  { %2298 = vperm.xlu0 %2939, %v3411_v26  }
 0x76a   :  { %2294 = vperm.xlu0 %2939, %v3417_v63  }
 0x76c   :  { %v3010_v33 = vpop.eup %3009 }
 0x76d   :  { %2827 = vmatprep.subr.mxu1 %v3010_v33 }
 0x76e   :  { %v3012_v53 = vpop.eup %3011  ;;  %2828 = vmatpush3.msra.mxu1 %v3010_v33  ;;  %2290 = vperm.xlu0 %2939, %v3419_v28  }
 0x76f   :  { %2829 = vmatprep.subr.mxu1 %v3012_v53  ;;  %v3014_v13 = vpop.eup %3013 }
 0x770   :  { %2830 = vmatpush3.msra.mxu1 %v3012_v53  ;;  %v3016_v32 = vpop.eup %3015 }
 0x771   :  { %2831 = vmatprep.subr.mxu1 %v3014_v13 }
 0x772   :  { %2832 = vmatpush3.msra.mxu1 %v3014_v13  ;;  %2491 = vrot.lane.b32.xlu0 %v3152_v7, %s3098_s30 }
 0x773   :  { %2833 = vmatprep.subr.mxu1 %v3016_v32 }
 0x774   :  { %2834 = vmatpush3.msra.mxu1 %v3016_v32 }
 0x775   :  { %2836 = vmatmul.mubr.msk.f32.vlgmr.msra.gmra.mxu1 %vm1686_vm6, %v3464_v15 }
 0x776   :  { %2838 = vmatprep.mubr.msk.f32.mxu1 %vm1686_vm6, %v3466_v16 }
 0x779   :  { %2839 = vmatmul.mubr.msk.f32.gmra.mxu1 %vm1686_vm6, %v3472_v19 }
 0x77a   :  { %2863 = vmatprep.mubr.msk.f32.mxu1 %vm1686_vm6, %v3442_v46 }
 0x835   :  { %v2837_v23 = vpop.f32.mrf.mxu1 }
 0x836   :  { %v1938_v31 = vadd.f32 %v2837_v23, %v1837_v12  ;;  %v3105_v23 = vmov 3  }
 0x837   :  { %v1918_v25 = vpop.f32.mrf.mxu1  ;;  %2937 = vset.pattern.permute.xlu1 %v3105_v23  ;;  %2944 = vset.pattern.permute.xlu0 %v3105_v23 }
 0x838   :  { %v1937_v38 = vadd.f32 %v1918_v25, %v1836_v34  ;;  %2403 = vperm.xlu1 %2937, %v3413_v27   ;;  %v2084_v27 = vpop.permute.xlu1 %2083 }
 0x839   :  { %v2840_v10 = vpop.f32.mrf.mxu1 }
 0x83a   :  { %v1940_v56 = vadd.f32 %v2840_v10, %v1839_v9  ;;  %v2069_v10 = vmul.f32 %v3456_v52, %v2065_v24 }
 0x83b   :  { %v1928_v62 = vpop.f32.mrf.mxu1 }
 0x83c   :  { %3017 = vtanh.f32 %v1940_v56  ;;  %v1939_v35 = vadd.f32 %v1928_v62, %v1838_v29  ;;  %2938 = vset.pattern.permute.xlu1 %v3104_v22  ;;  %v2076_v25 = vpop.permute.xlu1 %2075  ;;  %v2068_v56 = vmul.f32 %v2065_v24, %v3460_v57  ;;  %v2089_v62 = vadd.f32 %v2084_v27, %v2069_v10 }
 0x83d   :  { %2192 = vperm.xlu1 %2938, %v3417_v63  }
 0x83e   :  { %3019 = vtanh.f32 %v1939_v35 }
 0x83f   :  { %3021 = vtanh.f32 %v1938_v31 }
 0x840   :  { %3023 = vtanh.f32 %v1937_v38  ;;  %v2072_v9 = vpop.permute.xlu1 %2071 }
 0x841   :  { %2940 = vset.pattern.permute.xlu1 %v3105_v23  ;;  %v2086_v7 = vadd.f32 %v2072_v9, %v2066_v11 }
 0x842   :  { %2399 = vperm.xlu1 %2940, %v3411_v26   ;;  %v2067_v26 = vmul.f32 %v3452_v48, %v2065_v24 }
 0x844   :  { %v2087_v3 = vadd.f32 %v2076_v25, %v2067_v26  ;;  %v1578_v35 = vpop.permute.xlu1 %1577 }
 0x845   :  { %v1674_v49 = vadd.f32 %v3484_v36, %v1578_v35 }
 0x846   :  { %2941 = vset.pattern.permute.xlu1 %v3104_v22 }
 0x847   :  { %2188 = vperm.xlu1 %2941, %v3419_v28  }
 0x848   :  { %v1573_v52 = vpop.permute.xlu1 %1572 }
 0x849   :  { %v3018_v60 = vpop.eup %3017  ;;  %v1669_v57 = vadd.f32 %v3478_v20, %v1573_v52  ;;  %v3107_v20 = vmov 0.0  }
 0x84a   :  { %2841 = vmatprep.subr.mxu0 %v3018_v60 }
 0x84b   :  { %v3020_v40 = vpop.eup %3019  ;;  %2842 = vmatpush3.msra.mxu0 %v3018_v60  ;;  %2942 = vset.pattern.permute.xlu1 %v3105_v23 }
 0x84c   :  { %2843 = vmatprep.subr.mxu0 %v3020_v40  ;;  %v3022_v41 = vpop.eup %3021  ;;  %2395 = vperm.xlu1 %2942, %v3417_v63   ;;  %v2080_v63 = vpop.permute.xlu0 %2079 }
 0x84d   :  { %2844 = vmatpush3.msra.mxu0 %v3020_v40  ;;  %v3024_v42 = vpop.eup %3023  ;;  %v2088_v34 = vadd.f32 %v2080_v63, %v2068_v56 }
 0x84e   :  { %2845 = vmatprep.subr.mxu0 %v3022_v41 }
 0x84f   :  { %2846 = vmatpush3.msra.mxu0 %v3022_v41 }
 0x850   :  { %2847 = vmatprep.subr.mxu0 %v3024_v42  ;;  %2391 = vperm.xlu1 %2942, %v3419_v28   ;;  %v1583_v60 = vpop.permute.xlu0 %1582 }
 0x851   :  { %2848 = vmatpush3.msra.mxu0 %v3024_v42  ;;  %v1679_v45 = vadd.f32 %v3482_v0, %v1583_v60  ;;  %v3109_v0 = vmov 32  }
 0x852   :  { %2850 = vmatmul.mubr.msk.f32.vlgmr.msra.gmra.mxu0 %vm1686_vm6, %v3464_v15 }
 0x853   :  { %2852 = vmatprep.mubr.msk.f32.mxu0 %vm1686_vm6, %v3466_v16 }
 0x854   :  { %v1568_v40 = vpop.permute.xlu0 %1567  ;;  %2943 = vset.pattern.permute.xlu1 %v3109_v0 }
 0x855   :  { %v1664_v42 = vadd.f32 %v3480_v37, %v1568_v40  ;;  %v3540_v37 = vld [vmem:[#allocation2 + $0x140] sm:$0xf] }
 0x856   :  { %2853 = vmatmul.mubr.msk.f32.gmra.mxu0 %vm1686_vm6, %v3472_v19  ;;  %2315 = vperm.xlu1 %2943, %v3540_v37  }
 0x857   :  { %2877 = vmatprep.mubr.msk.f32.mxu0 %vm1686_vm6, %v3442_v46 }
 0x912   :  { %v2851_v44 = vpop.f32.mrf.mxu0 }
 0x913   :  { %v2057_v33 = vadd.f32 %v2851_v44, %v1968_v2 }
 0x914   :  { %v2037_v55 = vpop.f32.mrf.mxu0 }
 0x915   :  { %v2056_v13 = vadd.f32 %v2037_v55, %v1967_v14 }
 0x916   :  { %v2854_v54 = vpop.f32.mrf.mxu0 }
 0x917   :  { %v2059_v46 = vadd.f32 %v2854_v54, %v1970_v1 }
 0x918   :  { %v2047_v6 = vpop.f32.mrf.mxu0 }
 0x919   :  { %3025 = vtanh.f32 %v2059_v46  ;;  %v2058_v53 = vadd.f32 %v2047_v6, %v1969_v5 }
 0x91b   :  { %3027 = vtanh.f32 %v2058_v53 }
 0x91c   :  { %3029 = vtanh.f32 %v2057_v33 }
 0x91d   :  { %3031 = vtanh.f32 %v2056_v13 }
 0x926   :  { %v3026_v32 = vpop.eup %3025 }
 0x927   :  { %2855 = vmatprep.subr.mxu1 %v3026_v32 }
 0x928   :  { %v3028_v17 = vpop.eup %3027  ;;  %2856 = vmatpush3.msra.mxu1 %v3026_v32 }
 0x929   :  { %2857 = vmatprep.subr.mxu1 %v3028_v17  ;;  %v3030_v61 = vpop.eup %3029 }
 0x92a   :  { %2858 = vmatpush3.msra.mxu1 %v3028_v17  ;;  %v3032_v21 = vpop.eup %3031 }
 0x92b   :  { %2859 = vmatprep.subr.mxu1 %v3030_v61 }
 0x92c   :  { %2860 = vmatpush3.msra.mxu1 %v3030_v61 }
 0x92d   :  { %2861 = vmatprep.subr.mxu1 %v3032_v21 }
 0x92e   :  { %2862 = vmatpush3.msra.mxu1 %v3032_v21 }
 0x92f   :  { %2864 = vmatmul.mubr.msk.f32.vlgmr.msra.gmra.mxu1 %vm1686_vm6, %v3464_v15  ;;  %2883 = vmatprep.subr.mxu1 %v3107_v20 }
 0x930   :  { %2866 = vmatprep.mubr.msk.f32.mxu1 %vm1686_vm6, %v3466_v16 }
 0x933   :  { %2867 = vmatmul.mubr.msk.f32.gmra.mxu1 %vm1686_vm6, %v3472_v19 }
 0x934   :  { %2891 = vmatprep.mubr.msk.f32.mxu1 %vm3108_vm7, %v3107_v20 }
 0x9ef   :  { %v2865_v12 = vpop.f32.mrf.mxu1 }
 0x9f0   :  { %v2176_v29 = vadd.f32 %v2865_v12, %v2087_v3 }
 0x9f1   :  { %v2156_v30 = vpop.f32.mrf.mxu1 }
 0x9f2   :  { %3033 = vtanh.f32 %v2176_v29  ;;  %v2175_v28 = vadd.f32 %v2156_v30, %v2086_v7 }
 0x9f3   :  { %v2868_v31 = vpop.f32.mrf.mxu1 }
 0x9f4   :  { %3035 = vtanh.f32 %v2175_v28  ;;  %v2178_v48 = vadd.f32 %v2868_v31, %v2089_v62 }
 0x9f5   :  { %v2166_v50 = vpop.f32.mrf.mxu1 }
 0x9f6   :  { %3037 = vtanh.f32 %v2178_v48  ;;  %v2177_v38 = vadd.f32 %v2166_v50, %v2088_v34 }
 0x9f8   :  { %3039 = vtanh.f32 %v2177_v38 }
 0x9ff   :  { %v3034_v41 = vpop.eup %3033 }
 0xa00   :  { %v2184_v58 = vadd.f32 %v3034_v41, %v1669_v57 }
 0xa01   :  { %v3036_v43 = vpop.eup %3035 }
 0xa02   :  { %v2183_v47 = vadd.f32 %v3036_v43, %v1664_v42 }
 0xa03   :  { %v3038_v44 = vpop.eup %3037 }
 0xa04   :  { %v2186_v51 = vadd.f32 %v3038_v44, %v1679_v45 }
 0xa05   :  { %v3040_v55 = vpop.eup %3039 }
 0xa06   :  { %2869 = vmatprep.subr.mxu0 %v2186_v51  ;;  %v2185_v39 = vadd.f32 %v3040_v55, %v1674_v49 }
 0xa07   :  { %2870 = vmatpush3.msra.mxu0 %v2186_v51 }
 0xa08   :  { %2871 = vmatprep.subr.mxu0 %v2185_v39 }
 0xa09   :  { %2872 = vmatpush3.msra.mxu0 %v2185_v39 }
 0xa0a   :  { %2873 = vmatprep.subr.mxu0 %v2184_v58 }
 0xa0b   :  { %2874 = vmatpush3.msra.mxu0 %v2184_v58 }
 0xa0c   :  { %2875 = vmatprep.subr.mxu0 %v2183_v47 }
 0xa0d   :  { %2876 = vmatpush3.msra.mxu0 %v2183_v47 }
 0xa0e   :  { %2878 = vmatmul.mubr.msk.f32.vlgmr.msra.gmra.mxu0 %vm1686_vm6, %v3464_v15  ;;  %2894 = vmatprep.subr.mxu0 %v3107_v20  ;;  %v2201_v15 = vpop.permute.xlu1 %2200 }
 0xa0f   :  { %2880 = vmatprep.mubr.msk.f32.mxu0 %vm1686_vm6, %v3466_v16 }
 0xa12   :  { %2881 = vmatmul.mubr.msk.f32.gmra.mxu0 %vm1686_vm6, %v3472_v19  ;;  %v2404_v16 = vpop.permute.xlu1 %2403  ;;  %v2197_v19 = vpop.permute.xlu0 %2196 }
 0xa13   :  { %2902 = vmatprep.mubr.msk.f32.mxu0 %vm3108_vm7, %v3107_v20 }
 0xa16   :  { %v2193_v36 = vpop.permute.xlu1 %2192  ;;  %v2303_v1 = vpop.permute.xlu0 %2302 }
 0xa1a   :  { %v2400_v59 = vpop.permute.xlu1 %2399  ;;  %v2299_v54 = vpop.permute.xlu0 %2298 }
 0xa1e   :  { %v2189_v4 = vpop.permute.xlu1 %2188  ;;  %v2295_v6 = vpop.permute.xlu0 %2294 }
 0xa22   :  { %v2396_v5 = vpop.permute.xlu1 %2395  ;;  %v2291_v25 = vpop.permute.xlu0 %2290 }
 0xa26   :  { %v2392_v27 = vpop.permute.xlu1 %2391  ;;  %v2492_v38 = vpop.permute.xlu0 %2491 }
 0xa2a   :  { %v2316_v30 = vpop.permute.xlu1 %2315 }
 0xace   :  { %v2879_v2 = vpop.f32.mrf.mxu0 }
 0xacf   :  { %v2275_v33 = vadd.f32 %v2879_v2, %v2193_v36 }
 0xad0   :  { %v2269_v46 = vpop.f32.mrf.mxu0 }
 0xad1   :  { %v2270_v32 = vadd.f32 %v2269_v46, %v2189_v4  ;;  %v2306_v22 = vadd.f32 %v2295_v6, %v2275_v33  ;;  %v2407_v24 = vadd.f32 %v2396_v5, %v2275_v33 }
 0xad2   :  { %v2882_v14 = vpop.f32.mrf.mxu0 }
 0xad3   :  { %v2285_v53 = vadd.f32 %v2882_v14, %v2201_v15  ;;  %v2305_v26 = vadd.f32 %v2291_v25, %v2270_v32  ;;  %v2406_v11 = vadd.f32 %v2392_v27, %v2270_v32 }
 0xad4   :  { %v2279_v13 = vpop.f32.mrf.mxu0 }
 0xad5   :  { %v2308_v17 = vadd.f32 %v2303_v1, %v2285_v53  ;;  %v2409_v61 = vadd.f32 %v2404_v16, %v2285_v53  ;;  %v2280_v21 = vadd.f32 %v2279_v13, %v2197_v19 }
 0xad7   :  { %3041 = vtanh.f32 %v2308_v17  ;;  %v2307_v23 = vadd.f32 %v2299_v54, %v2280_v21  ;;  %v2408_v18 = vadd.f32 %v2400_v59, %v2280_v21 }
 0xad8   :  { %3043 = vtanh.f32 %v2409_v61 }
 0xad9   :  { %3045 = vtanh.f32 %v2307_v23 }
 0xada   :  { %3047 = vtanh.f32 %v2408_v18 }
 0xadb   :  { %3049 = vtanh.f32 %v2306_v22 }
 0xadc   :  { %3051 = vtanh.f32 %v2407_v24 }
 0xadd   :  { %3053 = vtanh.f32 %v2305_v26 }
 0xade   :  { %3055 = vtanh.f32 %v2406_v11 }
 0xae4   :  { %v3042_v9 = vpop.eup %3041 }
 0xae5   :  { %v3044_v3 = vpop.eup %3043  ;;  %2884 = vmatpush3.msra.mxu1 %v3042_v9 }
 0xae6   :  { %v3046_v10 = vpop.eup %3045  ;;  %2895 = vmatpush3.msra.mxu0 %v3044_v3  ;;  %2885 = vmatprep.subr.mxu1 %v3107_v20 }
 0xae7   :  { %v3048_v12 = vpop.eup %3047  ;;  %2896 = vmatprep.subr.mxu0 %v3107_v20  ;;  %2886 = vmatpush3.msra.mxu1 %v3046_v10 }
 0xae8   :  { %v3050_v7 = vpop.eup %3049  ;;  %2897 = vmatpush3.msra.mxu0 %v3048_v12  ;;  %2887 = vmatprep.subr.mxu1 %v3107_v20 }
 0xae9   :  { %v3052_v56 = vpop.eup %3051  ;;  %2898 = vmatprep.subr.mxu0 %v3107_v20  ;;  %2888 = vmatpush3.msra.mxu1 %v3050_v7 }
 0xaea   :  { %v3054_v29 = vpop.eup %3053  ;;  %2899 = vmatpush3.msra.mxu0 %v3052_v56  ;;  %2889 = vmatprep.subr.mxu1 %v3107_v20 }
 0xaeb   :  { %v3056_v63 = vpop.eup %3055  ;;  %2900 = vmatprep.subr.mxu0 %v3107_v20  ;;  %2890 = vmatpush3.msra.mxu1 %v3054_v29 }
 0xaec   :  { %2901 = vmatpush3.msra.mxu0 %v3056_v63  ;;  %2892 = vmatmul.mubr.msk.f32.vlgmr.msra.gmra.mxu1 %vm1686_vm6, %v3540_v37 }
 0xaed   :  { %2903 = vmatmul.mubr.msk.f32.vlgmr.msra.gmra.mxu0 %vm1686_vm6, %v3540_v37 }
 0xbac   :  { %v2386_v28 = vpop.f32.mrf.mxu1 }
 0xbad   :  { %v2480_v62 = vpop.f32.mrf.mxu0  ;;  %v2387_v50 = vadd.f32 %v2386_v28, %v2316_v30 }
 0xbae   :  { %v2481_v31 = vadd.f32 %v2480_v62, %v2316_v30  ;;  %v2893_v34 = vpop.f32.mrf.mxu1 }
 0xbaf   :  { %v2904_v48 = vpop.f32.mrf.mxu0 }
 0xbb0   :  { %v2485_v35 = vrot.slane %v2481_v31, 4 }
 0xbb2   :  { %v2487_v60 = vsel %vm123_vm1, %v2387_v50, %v2485_v35 }
 0xbb3   :  { %v2488_v52 = vadd.f32 %v2487_v60, %v3154_v8  ;;  %v2494_v40 = vadd.f32 %v2492_v38, %v2487_v60 }
 0xbb5   :  { %2489 = vst.msk [vmem:[%s3566_s3] sm:$0xff] %vm71_vm0, %v2488_v52  ;;  %2496 = vrot.lane.b32.xlu1 %v2494_v40, %s3110_s10 }
 0xc27   :  { %v2497_v57 = vpop.permute.xlu1 %2496 }
 0xc28   :  { %2592 = vst.msk [vmem:[%s3566_s3 + $0x8] sm:$0xff] %vm71_vm0, %v2497_v57 }
 0xc29   :  { %2505 = vsyncpa [#allocation3], 1 }
 0xc2a   :  { %2506 = vsyncpa [#allocation4], 1 }

</bundles_post_ra>
